<compile_context>
chip_gen: v7x
topology: tpu7x:2x2x1
jax: 0.10.0
libtpu: 0.0.40
codegen_flags: <defaults>
</compile_context>

<pallas_src>
import functools

import jax
import jax.numpy as jnp
from jax.experimental import pallas as pl
from jax.experimental.pallas import tpu as pltpu

LN_EPS = 1e-5  # torch.nn.LayerNorm default


def prenorm_kernel(x_ref, gamma_ref, beta_ref, w_ref, b_ref, o_ref, normed_ref):
    """Fused LayerNorm (over last dim) + Linear for one (rows x out-cols) tile.

    x_ref      : (TM, D)   input rows
    gamma_ref  : (1, D)    LayerNorm weight
    beta_ref   : (1, D)    LayerNorm bias
    w_ref      : (D, TN)   Linear weight column block, (in, out) layout
    b_ref      : (1, TN)   Linear bias block
    o_ref      : (TM, TN)  output tile
    normed_ref : (TM, D)   VMEM scratch holding LayerNorm(x) for this row tile
    """
    j = pl.program_id(1)  # output-column (H) tile index, innermost axis

    # LayerNorm only once per row tile; result cached across all H tiles.
    @pl.when(j == 0)
    def _():
        x = x_ref[...].astype(jnp.float32)
        mean = jnp.mean(x, axis=-1, keepdims=True)
        xc = x - mean
        var = jnp.mean(xc * xc, axis=-1, keepdims=True)
        inv = jax.lax.rsqrt(var + LN_EPS)
        normed = (
            xc * inv * gamma_ref[...].astype(jnp.float32)
            + beta_ref[...].astype(jnp.float32)
        )
        normed_ref[...] = normed.astype(normed_ref.dtype)

    # fn = Linear(dim -> hidden): MXU matmul in W's native dtype, f32 accum.
    out = jnp.dot(
        normed_ref[...],
        w_ref[...],
        preferred_element_type=jnp.float32,
    ) + b_ref[...].astype(jnp.float32)

    o_ref[...] = out.astype(o_ref.dtype)


@functools.partial(jax.jit, static_argnames=("tile_m", "tile_n"))
def prenorm_linear(x, gamma, beta, w, b, *, tile_m=256, tile_n=256):
    """x: (B, S, D); gamma/beta: (D,); w: (D, H); b: (H,). Returns (B, S, H)."""
    B, S, D = x.shape
    H = w.shape[1]
    N = B * S

    # Keep the output column tile lane-dense; fall back to full H if it does
    # not divide evenly (H is a static shape, so this is trace-time logic).
    if H % tile_n != 0:
        tile_n = H

    # Pad the row count up to a multiple of tile_m (padded rows are discarded).
    num_m = -(-N // tile_m)
    Np = num_m * tile_m

    x2 = x.reshape(N, D)
    if Np != N:
        x2 = jnp.pad(x2, ((0, Np - N), (0, 0)))
    gamma2 = gamma.reshape(1, D)
    beta2 = beta.reshape(1, D)
    b2 = b.reshape(1, H)

    num_n = H // tile_n
    # Grid: (row_tile, h_tile).  The H axis is innermost so the x row tile and
    # its cached LayerNorm stay resident while we sweep W column blocks.
    grid = (num_m, num_n)

    out2 = pl.pallas_call(
        prenorm_kernel,
        out_shape=jax.ShapeDtypeStruct((Np, H), x.dtype),
        grid_spec=pltpu.PrefetchScalarGridSpec(
            num_scalar_prefetch=0,
            grid=grid,
            in_specs=[
                pl.BlockSpec((tile_m, D), lambda i, j: (i, 0)),   # x rows
                pl.BlockSpec((1, D), lambda i, j: (0, 0)),        # gamma
                pl.BlockSpec((1, D), lambda i, j: (0, 0)),        # beta
                pl.BlockSpec((D, tile_n), lambda i, j: (0, j)),   # W column block
                pl.BlockSpec((1, tile_n), lambda i, j: (0, j)),   # bias block
            ],
            out_specs=pl.BlockSpec((tile_m, tile_n), lambda i, j: (i, j)),
            scratch_shapes=[pltpu.VMEM((tile_m, D), w.dtype)],    # cached LN(x)
        ),
        compiler_params=pltpu.CompilerParams(
            # Row axis is embarrassingly parallel (megacore-shardable); the H
            # axis carries the LN scratch dependency -> arbitrary (sequential).
            dimension_semantics=("parallel", "arbitrary"),
            # Explicit budget, safe for v7x's 64 MiB VMEM; actual working set
            # here is far smaller (double-buffered tiles + one LN scratch).
            vmem_limit_bytes=48 * 1024 * 1024,
        ),
    )(x2, gamma2, beta2, w, b2)

    if Np != N:
        out2 = out2[:N]
    return out2.reshape(B, S, H)


def reference(x, gamma, beta, w, b):
    xf = x.astype(jnp.float32)
    mean = jnp.mean(xf, axis=-1, keepdims=True)
    var = jnp.mean((xf - mean) ** 2, axis=-1, keepdims=True)
    normed = (xf - mean) / jnp.sqrt(var + LN_EPS) * gamma + beta
    return (normed @ w.astype(jnp.float32) + b).astype(x.dtype)


if __name__ == "__main__":
    key = jax.random.PRNGKey(0)
    # Small but layout-realistic shapes.  N = B*S = 400 is NOT a multiple of
    # tile_m (exercises row padding); H = 512 gives two output-column tiles
    # (exercises the cached-LayerNorm reuse across the inner grid axis).
    B, S, D, H = 2, 200, 128, 512

    kx, kg, kb0, kw, kb = jax.random.split(key, 5)
    x = jax.random.normal(kx, (B, S, D), dtype=jnp.float32)

    # PreNorm params (non-trivial to exercise the affine part of LayerNorm).
    gamma = 1.0 + 0.1 * jax.random.normal(kg, (D,), dtype=jnp.float32)
    beta = 0.1 * jax.random.normal(kb0, (D,), dtype=jnp.float32)

    # fn params: deterministic synthetic Linear(dim, hidden).
    w = jax.random.normal(kw, (D, H), dtype=jnp.float32) * 0.02
    b = jax.random.normal(kb, (H,), dtype=jnp.float32) * 0.02

    out = prenorm_linear(x, gamma, beta, w, b)
    jax.block_until_ready(out)

    ref = reference(x, gamma, beta, w, b)
    assert out.shape == (B, S, H), out.shape
    assert jnp.allclose(out, ref, atol=1e-3, rtol=1e-3), "mismatch vs reference"

    print("KERNEL_OK")
</pallas_src>

<mosaic_0001>
module attributes {stable_mosaic.version = 11 : i64} {
  func.func @prenorm_kernel(%arg0: i32, %arg1: i32, %arg2: memref<256x128xf32, #tpu.memory_space<vmem>>, %arg3: memref<1x128xf32, #tpu.memory_space<vmem>>, %arg4: memref<1x128xf32, #tpu.memory_space<vmem>>, %arg5: memref<128x256xf32, #tpu.memory_space<vmem>>, %arg6: memref<1x256xf32, #tpu.memory_space<vmem>>, %arg7: memref<256x256xf32, #tpu.memory_space<vmem>>, %arg8: memref<256x128xf32, #tpu.memory_space<vmem>>) attributes {dimension_semantics = [#tpu.dimension_semantics<parallel>, #tpu.dimension_semantics<arbitrary>], iteration_bounds = array<i64: 2, 2>, scalar_prefetch = 0 : i64, scratch_operands = 1 : i64, tpu.core_type = #tpu.core_type<tc>, window_params = [{transform_indices = @transform_0, window_bounds = array<i64: 256, 128>}, {pipeline_mode = #tpu.pipeline_mode<synchronous>, transform_indices = @transform_1, window_bounds = array<i64: 1, 128>}, {pipeline_mode = #tpu.pipeline_mode<synchronous>, transform_indices = @transform_2, window_bounds = array<i64: 1, 128>}, {transform_indices = @transform_3, window_bounds = array<i64: 128, 256>}, {transform_indices = @transform_4, window_bounds = array<i64: 1, 256>}, {transform_indices = @transform_5, window_bounds = array<i64: 256, 256>}]} {
    %c0_i32 = arith.constant 0 : i32
    %0 = arith.cmpi eq, %arg1, %c0_i32 : i32
    %1 = arith.extui %0 : i1 to i32
    %c0_i32_0 = arith.constant 0 : i32
    %2 = arith.cmpi ne, %1, %c0_i32_0 : i32
    scf.if %2 {
      %c0_8 = arith.constant 0 : index
      %c0_9 = arith.constant 0 : index
      %10 = vector.load %arg2[%c0_8, %c0_9] : memref<256x128xf32, #tpu.memory_space<vmem>>, vector<256x128xf32>
      %cst_10 = arith.constant dense<0.000000e+00> : vector<256xf32>
      %11 = vector.multi_reduction <add>, %10, %cst_10 [1] : vector<256x128xf32> to vector<256xf32>
      %12 = vector.shape_cast %11 : vector<256xf32> to vector<256x1xf32>
      %cst_11 = arith.constant 1.280000e+02 : f32
      %13 = vector.broadcast %cst_11 : f32 to vector<256x1xf32>
      %14 = arith.divf %12, %13 : vector<256x1xf32>
      %15 = vector.broadcast %14 : vector<256x1xf32> to vector<256x128xf32>
      %16 = arith.subf %10, %15 : vector<256x128xf32>
      %17 = arith.mulf %16, %16 : vector<256x128xf32>
      %cst_12 = arith.constant dense<0.000000e+00> : vector<256xf32>
      %18 = vector.multi_reduction <add>, %17, %cst_12 [1] : vector<256x128xf32> to vector<256xf32>
      %19 = vector.shape_cast %18 : vector<256xf32> to vector<256x1xf32>
      %cst_13 = arith.constant 1.280000e+02 : f32
      %20 = vector.broadcast %cst_13 : f32 to vector<256x1xf32>
      %21 = arith.divf %19, %20 : vector<256x1xf32>
      %cst_14 = arith.constant 9.99999974E-6 : f32
      %22 = vector.broadcast %cst_14 : f32 to vector<256x1xf32>
      %23 = arith.addf %21, %22 : vector<256x1xf32>
      %24 = math.rsqrt %23 : vector<256x1xf32>
      %25 = vector.broadcast %24 : vector<256x1xf32> to vector<256x128xf32>
      %26 = arith.mulf %16, %25 : vector<256x128xf32>
      %c0_15 = arith.constant 0 : index
      %c0_16 = arith.constant 0 : index
      %27 = vector.load %arg3[%c0_15, %c0_16] : memref<1x128xf32, #tpu.memory_space<vmem>>, vector<1x128xf32>
      %28 = vector.broadcast %27 : vector<1x128xf32> to vector<256x128xf32>
      %29 = arith.mulf %26, %28 : vector<256x128xf32>
      %c0_17 = arith.constant 0 : index
      %c0_18 = arith.constant 0 : index
      %30 = vector.load %arg4[%c0_17, %c0_18] : memref<1x128xf32, #tpu.memory_space<vmem>>, vector<1x128xf32>
      %31 = vector.broadcast %30 : vector<1x128xf32> to vector<256x128xf32>
      %32 = arith.addf %29, %31 : vector<256x128xf32>
      %c0_19 = arith.constant 0 : index
      %c0_20 = arith.constant 0 : index
      %33 = vector.load %arg8[%c0_19, %c0_20] : memref<256x128xf32, #tpu.memory_space<vmem>>, vector<256x128xf32>
      tpu.vector_store %arg8[%c0_19, %c0_20], %32 {strides = array<i32>} : memref<256x128xf32, #tpu.memory_space<vmem>>, vector<256x128xf32>,
    } else {
    }
    %c0 = arith.constant 0 : index
    %c0_1 = arith.constant 0 : index
    %3 = vector.load %arg8[%c0, %c0_1] : memref<256x128xf32, #tpu.memory_space<vmem>>, vector<256x128xf32>
    %c0_2 = arith.constant 0 : index
    %c0_3 = arith.constant 0 : index
    %4 = vector.load %arg5[%c0_2, %c0_3] : memref<128x256xf32, #tpu.memory_space<vmem>>, vector<128x256xf32>
    %cst = arith.constant dense<0.000000e+00> : vector<256x256xf32>
    %5 = tpu.matmul %3, %4, %cst {dimension_numbers = #tpu.dot_dimension_numbers<[1], [0], [0], [1], [0, 0, 1, 1], [], []>} : vector<256x128xf32>, vector<128x256xf32>, vector<256x256xf32> -> vector<256x256xf32>
    %c0_4 = arith.constant 0 : index
    %c0_5 = arith.constant 0 : index
    %6 = vector.load %arg6[%c0_4, %c0_5] : memref<1x256xf32, #tpu.memory_space<vmem>>, vector<1x256xf32>
    %7 = vector.broadcast %6 : vector<1x256xf32> to vector<256x256xf32>
    %8 = arith.addf %5, %7 : vector<256x256xf32>
    %c0_6 = arith.constant 0 : index
    %c0_7 = arith.constant 0 : index
    %9 = vector.load %arg7[%c0_6, %c0_7] : memref<256x256xf32, #tpu.memory_space<vmem>>, vector<256x256xf32>
    tpu.vector_store %arg7[%c0_6, %c0_7], %8 {strides = array<i32>} : memref<256x256xf32, #tpu.memory_space<vmem>>, vector<256x256xf32>,
    return
  }
  func.func @transform_0(%arg0: i32, %arg1: i32) -> (i32, i32) {
    %c0_i32 = arith.constant 0 : i32
    %c0_i32_0 = arith.constant 0 : i32
    return %arg0, %c0_i32 : i32, i32
  }
  func.func @transform_1(%arg0: i32, %arg1: i32) -> (i32, i32) {
    %c0_i32 = arith.constant 0 : i32
    %c0_i32_0 = arith.constant 0 : i32
    %c0_i32_1 = arith.constant 0 : i32
    return %c0_i32, %c0_i32_0 : i32, i32
  }
  func.func @transform_2(%arg0: i32, %arg1: i32) -> (i32, i32) {
    %c0_i32 = arith.constant 0 : i32
    %c0_i32_0 = arith.constant 0 : i32
    %c0_i32_1 = arith.constant 0 : i32
    return %c0_i32, %c0_i32_0 : i32, i32
  }
  func.func @transform_3(%arg0: i32, %arg1: i32) -> (i32, i32) {
    %c0_i32 = arith.constant 0 : i32
    %c0_i32_0 = arith.constant 0 : i32
    return %c0_i32, %arg1 : i32, i32
  }
  func.func @transform_4(%arg0: i32, %arg1: i32) -> (i32, i32) {
    %c0_i32 = arith.constant 0 : i32
    %c0_i32_0 = arith.constant 0 : i32
    return %c0_i32, %arg1 : i32, i32
  }
  func.func @transform_5(%arg0: i32, %arg1: i32) -> (i32, i32) {
    %c0_i32 = arith.constant 0 : i32
    return %arg0, %arg1 : i32, i32
  }
}

</mosaic_0001>

<bundles_post_ra>
// kernel: prenorm_linear.1
= control target key start
LH: loop header
LB: loop body
LE: loop exit
PB: predicated region body
PF: predicated region fallthrough
CT: control target
= control target key end

     0   :  { %s2749_s0 = inlined_call_operand.vmem [shape: f32[512,128], index: 0, kind: input, shape index: {}]   ;;  %s2750_s1 = inlined_call_operand.vmem [shape: f32[1,128], index: 1, kind: input, shape index: {}]   ;;  %s2751_s2 = inlined_call_operand.vmem [shape: f32[1,128], index: 2, kind: input, shape index: {}]   ;;  %s2752_s3 = inlined_call_operand.vmem [shape: f32[128,512], index: 3, kind: input, shape index: {}]   ;;  %s2753_s4 = inlined_call_operand.vmem [shape: f32[1,512], index: 4, kind: input, shape index: {}]   ;;  %s2754_s5 = inlined_call_operand.vmem [shape: f32[512,512], index: 5, kind: output, shape index: {}]  }
   0x1   :  { %2755 = sst [smem:[#allocation5_spill]] %s2752_s3 }
   0x2   :  { %s1816_s18 = smov 0   ;;  %s1818_s19 = smov 0  }
   0x3   :  { %s1820_s20 = smov 0   ;;  %s1822_s21 = smov 0  }
   0x4   :  { %s1824_s22 = smov 0   ;;  %s1826_s23 = smov 0  }
   0x5   :  { %s1828_s24 = smov 0   ;;  %s1830_s25 = smov 0  }
   0x6   :  { %s1832_s26 = smov 0  }
   0x7 LB: > { %s1503_s27 = sadd.s32 4294967295, %s1783_s26   ;;  %s24_s28 = sadd.s32 1, %s1775_s24  ;;  %s1783_s26 = sphi %s1832_s26, %s15_s26   ;;  %s1779_s25 = sphi %s1830_s25, %s2765_s25   ;;  %s1775_s24 = sphi %s1828_s24, %s2764_s24   ;;  %s1771_s23 = sphi %s1826_s23, %s2763_s23   ;;  %s1767_s22 = sphi %s1824_s22, %s2762_s22   ;;  %s1763_s21 = sphi %s1822_s21, %s2761_s21   ;;  %s1759_s20 = sphi %s1820_s20, %s2760_s20   ;;  %s1755_s19 = sphi %s1818_s19, %s2759_s19   ;;  %s1751_s18 = sphi %s1816_s18, %s2758_s18  }
   0x8   : > { %p25_p0 = scmp.ge.s32.totalorder %s24_s28, 2  ;;  %s27_s29 = sadd.s32 1, %s1779_s25 }
   0x9   : > { %s102_s30 = sadd.s32 1, %s1763_s21  ;;  %p109_p1 = scmp.ne.s32.totalorder %s1763_s21, %s1759_s20 }
   0xa   : > { %s2767_s28 = smov (%p25_p0, %s24_s28), 0  ;;  %s2769_s29 = smov (!%p25_p0, %s27_s29), %s1779_s25 }
   0xb   : > { %s99_s6 = ssub.s32 %s1775_s24, %s2767_s28  ;;  %p110_p2 = scmp.eq.s32.totalorder %s1783_s26, 0 }
   0xc   : > { %p29_p3 = scmp.ge.s32.totalorder %s2769_s29, 2  ;;  %p100_p4 = scmp.eq.s32.totalorder %s99_s6, 0 }
   0xd   : > { %p111_p5 = por %p110_p2, %p109_p1  ;;  %s156_s7 = sadd.s32 1, %s1755_s19 }
   0xe   : > { %s2771_s29 = smov (%p29_p3, %s2769_s29), 0  ;;  %p166_p6 = scmp.ne.s32.totalorder %s1755_s19, %s1751_s18 }
   0xf   : > { %s1877_s8 = scalar_select %p100_p4, %s1763_s21, %s102_s30  }
  0x10   : > { %s151_s9 = ssub.s32 %s1779_s25, %s2771_s29  ;;  %p167_p7 = scmp.eq.s32.totalorder %s1503_s27, 3 }
  0x11   : > { %s153_s10 = sor.u32 %s151_s9, %s99_s6  ;;  %p1506_p10 = scmp.ge.s32.totalorder %s1783_s26, 4 }
  0x12   : > { %p154_p8 = scmp.eq.s32.totalorder %s153_s10, 0  ;;  %p1883_p9 = por %p167_p7, %p166_p6 }
  0x13   : > { %195 = sbr.rel (%p1506_p10) target bundleno = 52 (0x34), region = 24 }
  0x14   : > { %s1888_s12 = scalar_select %p154_p8, %s1755_s19, %s156_s7  }
  0x1a   : > { %207 = sbr.rel (!%p111_p5) target bundleno = 52 (0x34), region = 32  ;;  %s209_s13 = sand.u32 (%p111_p5), 1, %s1763_s21  }
  0x1b   : > { %s1526_s14 = sshll.u32 (%p111_p5), %s1775_s24, 4  ;;  %s1507_s15 = sshll.u32 (%p111_p5), %s209_s13, 8 }
  0x1c   : > { %s2757_s3 = sld [smem:[#allocation5_spill]] (%p111_p5)  ;;  %s1901_s30 = scalar_lea.vmem (%p111_p5), [#allocation3], %s1507_s15 }
  0x22   : > { %s1896_s27 = scalar_lea.vmem %s2757_s3, %s1526_s14 }
  0x23   : > { %v227_v0 = vld [vmem:[%s1896_s27] sm:$0xff]  ;;  %v229_v1 = vld [vmem:[%s1896_s27 + $0x8] sm:$0xff] }
  0x24   : > { %v231_v2 = vld [vmem:[%s1896_s27 + $0x20] sm:$0xff]  ;;  %228 = vst [vmem:[%s1901_s30] sm:$0xff] %v227_v0  ;;  %230 = vst [vmem:[%s1901_s30 + $0x8] sm:$0xff] %v229_v1  ;;  %v233_v3 = vld [vmem:[%s1896_s27 + $0x28] sm:$0xff] }
  0x25   : > { %232 = vst [vmem:[%s1901_s30 + $0x10] sm:$0xff] %v231_v2  ;;  %v235_v4 = vld [vmem:[%s1896_s27 + $0x40] sm:$0xff]  ;;  %v237_v5 = vld [vmem:[%s1896_s27 + $0x48] sm:$0xff]  ;;  %234 = vst [vmem:[%s1901_s30 + $0x18] sm:$0xff] %v233_v3 }
  0x26   : > { %236 = vst [vmem:[%s1901_s30 + $0x20] sm:$0xff] %v235_v4  ;;  %238 = vst [vmem:[%s1901_s30 + $0x28] sm:$0xff] %v237_v5  ;;  %v239_v6 = vld [vmem:[%s1896_s27 + $0x60] sm:$0xff]  ;;  %v241_v7 = vld [vmem:[%s1896_s27 + $0x68] sm:$0xff] }
  0x27   : > { %v243_v8 = vld [vmem:[%s1896_s27 + $0x80] sm:$0xff]  ;;  %240 = vst [vmem:[%s1901_s30 + $0x30] sm:$0xff] %v239_v6  ;;  %242 = vst [vmem:[%s1901_s30 + $0x38] sm:$0xff] %v241_v7  ;;  %v245_v9 = vld [vmem:[%s1896_s27 + $0x88] sm:$0xff] }
  0x28   : > { %244 = vst [vmem:[%s1901_s30 + $0x40] sm:$0xff] %v243_v8  ;;  %v247_v10 = vld [vmem:[%s1896_s27 + $0xa0] sm:$0xff]  ;;  %v249_v11 = vld [vmem:[%s1896_s27 + $0xa8] sm:$0xff]  ;;  %246 = vst [vmem:[%s1901_s30 + $0x48] sm:$0xff] %v245_v9 }
  0x29   : > { %248 = vst [vmem:[%s1901_s30 + $0x50] sm:$0xff] %v247_v10  ;;  %250 = vst [vmem:[%s1901_s30 + $0x58] sm:$0xff] %v249_v11  ;;  %v251_v12 = vld [vmem:[%s1896_s27 + $0xc0] sm:$0xff]  ;;  %v253_v13 = vld [vmem:[%s1896_s27 + $0xc8] sm:$0xff] }
  0x2a   : > { %v255_v14 = vld [vmem:[%s1896_s27 + $0xe0] sm:$0xff]  ;;  %252 = vst [vmem:[%s1901_s30 + $0x60] sm:$0xff] %v251_v12  ;;  %254 = vst [vmem:[%s1901_s30 + $0x68] sm:$0xff] %v253_v13  ;;  %v257_v15 = vld [vmem:[%s1896_s27 + $0xe8] sm:$0xff] }
  0x2b   : > { %256 = vst [vmem:[%s1901_s30 + $0x70] sm:$0xff] %v255_v14  ;;  %v259_v16 = vld [vmem:[%s1896_s27 + $0x100] sm:$0xff]  ;;  %v261_v17 = vld [vmem:[%s1896_s27 + $0x108] sm:$0xff]  ;;  %258 = vst [vmem:[%s1901_s30 + $0x78] sm:$0xff] %v257_v15 }
  0x2c   : > { %260 = vst [vmem:[%s1901_s30 + $0x80] sm:$0xff] %v259_v16  ;;  %262 = vst [vmem:[%s1901_s30 + $0x88] sm:$0xff] %v261_v17  ;;  %v263_v18 = vld [vmem:[%s1896_s27 + $0x120] sm:$0xff]  ;;  %v265_v19 = vld [vmem:[%s1896_s27 + $0x128] sm:$0xff] }
  0x2d   : > { %v267_v20 = vld [vmem:[%s1896_s27 + $0x140] sm:$0xff]  ;;  %264 = vst [vmem:[%s1901_s30 + $0x90] sm:$0xff] %v263_v18  ;;  %266 = vst [vmem:[%s1901_s30 + $0x98] sm:$0xff] %v265_v19  ;;  %v269_v21 = vld [vmem:[%s1896_s27 + $0x148] sm:$0xff] }
  0x2e   : > { %268 = vst [vmem:[%s1901_s30 + $0xa0] sm:$0xff] %v267_v20  ;;  %v271_v22 = vld [vmem:[%s1896_s27 + $0x160] sm:$0xff]  ;;  %v273_v23 = vld [vmem:[%s1896_s27 + $0x168] sm:$0xff]  ;;  %270 = vst [vmem:[%s1901_s30 + $0xa8] sm:$0xff] %v269_v21 }
  0x2f   : > { %272 = vst [vmem:[%s1901_s30 + $0xb0] sm:$0xff] %v271_v22  ;;  %274 = vst [vmem:[%s1901_s30 + $0xb8] sm:$0xff] %v273_v23  ;;  %v275_v24 = vld [vmem:[%s1896_s27 + $0x180] sm:$0xff]  ;;  %v277_v25 = vld [vmem:[%s1896_s27 + $0x188] sm:$0xff] }
  0x30   : > { %v279_v26 = vld [vmem:[%s1896_s27 + $0x1a0] sm:$0xff]  ;;  %276 = vst [vmem:[%s1901_s30 + $0xc0] sm:$0xff] %v275_v24  ;;  %278 = vst [vmem:[%s1901_s30 + $0xc8] sm:$0xff] %v277_v25  ;;  %v281_v27 = vld [vmem:[%s1896_s27 + $0x1a8] sm:$0xff] }
  0x31   : > { %280 = vst [vmem:[%s1901_s30 + $0xd0] sm:$0xff] %v279_v26  ;;  %v283_v28 = vld [vmem:[%s1896_s27 + $0x1c0] sm:$0xff]  ;;  %v285_v29 = vld [vmem:[%s1896_s27 + $0x1c8] sm:$0xff]  ;;  %282 = vst [vmem:[%s1901_s30 + $0xd8] sm:$0xff] %v281_v27 }
  0x32   : > { %284 = vst [vmem:[%s1901_s30 + $0xe0] sm:$0xff] %v283_v28  ;;  %286 = vst [vmem:[%s1901_s30 + $0xe8] sm:$0xff] %v285_v29  ;;  %v287_v30 = vld [vmem:[%s1896_s27 + $0x1e0] sm:$0xff]  ;;  %v289_v31 = vld [vmem:[%s1896_s27 + $0x1e8] sm:$0xff] }
  0x33   : > { %288 = vst [vmem:[%s1901_s30 + $0xf0] sm:$0xff] %v287_v30  ;;  %290 = vst [vmem:[%s1901_s30 + $0xf8] sm:$0xff] %v289_v31 }
  0x34 PF: > { %p1510_p11 = scmp.ge.s32.totalorder %s1783_s26, 1  ;;  %p303_p12 = scmp.lt.s32.totalorder %s1783_s26, 5 }
  0x36   : > { %p304_p13 = pnand %p1510_p11, %p303_p12 }
  0x37   : > { %s310_s6 = sand.u32 (!%p304_p13), 1, %s1759_s20   ;;  %s342_s7 = sand.u32 (!%p304_p13), 1, %s1751_s18  }
  0x38   : > { %307 = sbr.rel (%p304_p13) target bundleno = 773 (0x305), region = 59  ;;  %s1511_s9 = sshll.u32 (!%p304_p13), %s310_s6, 8 }
  0x39   : > { %s1512_s10 = sshll.u32 (!%p304_p13), %s342_s7, 9  ;;  %s1513_s13 = sshll.u32 (!%p304_p13), %s1771_s23, 5 }
  0x3a   : > { %s1970_s14 = sshll.u32 (!%p304_p13), %s1767_s22, 1  ;;  %p346_p0 = scmp.lt.s32.totalorder (!%p304_p13), %s1513_s13, 63 }
  0x3b   : > { %p353_p1 = scmp.lt.s32.totalorder (!%p304_p13), %s1970_s14, 3  ;;  %s1985_s7 = scalar_lea.vmem (!%p304_p13), [#allocation3], %s1511_s9 }
  0x3c   : > { %s1987_s3 = scalar_lea.vmem (!%p304_p13), [#allocation4], %s1512_s10  ;;  %p1516_p2 = scmp.ne.s32.totalorder (!%p304_p13), %s1767_s22, 0 }
  0x3f   : > { %s2773_s13 = smov (!%p346_p0, %s1513_s13), 63  ;;  %362 = sbr.rel (%p1516_p2) target bundleno = 444 (0x1bc), region = 67 }
  0x40   : > { %s1974_s15 = scalar_select %p353_p1, %s1970_s14, 3 }
  0x41   : > { %s1514_s16 = sshll.u32 %s2773_s13, 3 }
  0x42   : > { %s1979_s30 = scalar_lea.vmem %s2749_s0, %s1514_s16  ;;  %s355_s6 = scalar_lea.vmem %s2753_s4, %s1974_s15 }
  0x43   : > { %v1991_v32 = vld [vmem:[%s1979_s30] sm:$0xff] (!%p1516_p2)  ;;  %v1994_v33 = vld [vmem:[%s1979_s30 + $0x10] sm:$0xff] (!%p1516_p2)  ;;  %v1999_v34 = vld [vmem:[%s1979_s30 + $0x8] sm:$0xff] (!%p1516_p2) }
  0x44   : > { %395 = vadd.xlane.f32.xlu0 (!%p1516_p2), %v1991_v32  ;;  %399 = vadd.xlane.f32.xlu1 (!%p1516_p2), %v1994_v33  ;;  %v2002_v35 = vld [vmem:[%s1979_s30 + $0x18] sm:$0xff] (!%p1516_p2)  ;;  %v2007_v36 = vld [vmem:[%s1979_s30 + $0x20] sm:$0xff] (!%p1516_p2)  ;;  %v2010_v37 = vld [vmem:[%s1979_s30 + $0x28] sm:$0xff] (!%p1516_p2) }
  0x45   : > { %v2015_v38 = vld [vmem:[%s1979_s30 + $0x30] sm:$0xff] (!%p1516_p2)  ;;  %v2018_v39 = vld [vmem:[%s1979_s30 + $0x38] sm:$0xff] (!%p1516_p2)  ;;  %v2023_v40 = vld [vmem:[%s1979_s30 + $0x40] sm:$0xff] (!%p1516_p2) }
  0x46   : > { %v2026_v41 = vld [vmem:[%s1979_s30 + $0x48] sm:$0xff]  ;;  %v2031_v42 = vld [vmem:[%s1979_s30 + $0x50] sm:$0xff]  ;;  %v2034_v43 = vld [vmem:[%s1979_s30 + $0x58] sm:$0xff] }
  0x47   : > { %v2039_v44 = vld [vmem:[%s1979_s30 + $0x60] sm:$0xff]  ;;  %v2042_v45 = vld [vmem:[%s1979_s30 + $0x68] sm:$0xff]  ;;  %v2047_v46 = vld [vmem:[%s1979_s30 + $0x70] sm:$0xff] }
  0x48   : > { %397 = vadd.xlane.f32.xlu0 %v1999_v34  ;;  %401 = vadd.xlane.f32.xlu1 %v2002_v35  ;;  %v2050_v47 = vld [vmem:[%s1979_s30 + $0x78] sm:$0xff]  ;;  %v2055_v48 = vld [vmem:[%s1979_s30 + $0x80] sm:$0xff]  ;;  %v2058_v49 = vld [vmem:[%s1979_s30 + $0x88] sm:$0xff] }
  0x49   : > { %v2063_v50 = vld [vmem:[%s1979_s30 + $0x90] sm:$0xff]  ;;  %v2066_v51 = vld [vmem:[%s1979_s30 + $0x98] sm:$0xff]  ;;  %v2071_v52 = vld [vmem:[%s1979_s30 + $0xa0] sm:$0xff] }
  0x4a   : > { %v2074_v53 = vld [vmem:[%s1979_s30 + $0xa8] sm:$0xff]  ;;  %v2079_v54 = vld [vmem:[%s1979_s30 + $0xb0] sm:$0xff]  ;;  %v2082_v55 = vld [vmem:[%s1979_s30 + $0xb8] sm:$0xff] }
  0x4b   : > { %v2087_v56 = vld [vmem:[%s1979_s30 + $0xc0] sm:$0xff]  ;;  %v2090_v57 = vld [vmem:[%s1979_s30 + $0xc8] sm:$0xff]  ;;  %v2095_v58 = vld [vmem:[%s1979_s30 + $0xd0] sm:$0xff] }
  0x4c   : > { %403 = vadd.xlane.f32.xlu0 %v2007_v36  ;;  %405 = vadd.xlane.f32.xlu1 %v2010_v37  ;;  %v2098_v59 = vld [vmem:[%s1979_s30 + $0xd8] sm:$0xff]  ;;  %v2103_v60 = vld [vmem:[%s1979_s30 + $0xe0] sm:$0xff]  ;;  %v2106_v61 = vld [vmem:[%s1979_s30 + $0xe8] sm:$0xff] }
  0x4d   : > { %v2111_v62 = vld [vmem:[%s1979_s30 + $0xf0] sm:$0xff]  ;;  %v2114_v63 = vld [vmem:[%s1979_s30 + $0xf8] sm:$0xff] }
  0x50   : > { %407 = vadd.xlane.f32.xlu0 %v2015_v38  ;;  %409 = vadd.xlane.f32.xlu1 %v2018_v39 }
  0x54   : > { %411 = vadd.xlane.f32.xlu0 %v2023_v40  ;;  %413 = vadd.xlane.f32.xlu1 %v2026_v41 }
  0x58   : > { %415 = vadd.xlane.f32.xlu0 %v2031_v42  ;;  %417 = vadd.xlane.f32.xlu1 %v2034_v43 }
  0x5c   : > { %419 = vadd.xlane.f32.xlu0 %v2039_v44  ;;  %421 = vadd.xlane.f32.xlu1 %v2042_v45 }
  0x60   : > { %423 = vadd.xlane.f32.xlu0 %v2047_v46  ;;  %425 = vadd.xlane.f32.xlu1 %v2050_v47 }
  0x64   : > { %427 = vadd.xlane.f32.xlu0 %v2055_v48  ;;  %429 = vadd.xlane.f32.xlu1 %v2058_v49 }
  0x68   : > { %431 = vadd.xlane.f32.xlu0 %v2063_v50  ;;  %433 = vadd.xlane.f32.xlu1 %v2066_v51 }
  0x6c   : > { %435 = vadd.xlane.f32.xlu0 %v2071_v52  ;;  %437 = vadd.xlane.f32.xlu1 %v2074_v53 }
  0x70   : > { %439 = vadd.xlane.f32.xlu0 %v2079_v54  ;;  %441 = vadd.xlane.f32.xlu1 %v2082_v55 }
  0x74   : > { %443 = vadd.xlane.f32.xlu0 %v2087_v56  ;;  %445 = vadd.xlane.f32.xlu1 %v2090_v57 }
  0x78   : > { %447 = vadd.xlane.f32.xlu0 %v2095_v58  ;;  %449 = vadd.xlane.f32.xlu1 %v2098_v59 }
  0x7c   : > { %451 = vadd.xlane.f32.xlu0 %v2103_v60  ;;  %453 = vadd.xlane.f32.xlu1 %v2106_v61 }
  0x80   : > { %455 = vadd.xlane.f32.xlu0 %v2111_v62  ;;  %457 = vadd.xlane.f32.xlu1 %v2114_v63 }
  0xd1   : > { %v396_v0 = vpop.xlane.xlu0 %395  ;;  %v400_v1 = vpop.xlane.xlu1 %399 }
  0xd2   : > { %v460_v2 = vmul.f32 0.0078125, %v396_v0  ;;  %v462_v3 = vmul.f32 0.0078125, %v400_v1 }
  0xd4   : > { %v2119_v4 = vsub.f32 %v1991_v32, %v460_v2  ;;  %v2122_v5 = vsub.f32 %v1994_v33, %v462_v3 }
  0xd5   : > { %v398_v6 = vpop.xlane.xlu0 %397  ;;  %v402_v7 = vpop.xlane.xlu1 %401 }
  0xd6   : > { %v461_v8 = vmul.f32 0.0078125, %v398_v6  ;;  %v524_v9 = vmul.f32 %v2119_v4, %v2119_v4  ;;  %v463_v10 = vmul.f32 0.0078125, %v402_v7  ;;  %v526_v13 = vmul.f32 %v2122_v5, %v2122_v5 }
  0xd8   : > { %v2127_v11 = vsub.f32 %v1999_v34, %v461_v8  ;;  %556 = vadd.xlane.f32.xlu0 %v524_v9  ;;  %v2130_v12 = vsub.f32 %v2002_v35, %v463_v10 }
  0xd9   : > { %v404_v14 = vpop.xlane.xlu0 %403  ;;  %v406_v15 = vpop.xlane.xlu1 %405 }
  0xda   : > { %v464_v16 = vmul.f32 0.0078125, %v404_v14  ;;  %v525_v17 = vmul.f32 %v2127_v11, %v2127_v11  ;;  %v465_v18 = vmul.f32 0.0078125, %v406_v15  ;;  %v527_v21 = vmul.f32 %v2130_v12, %v2130_v12 }
  0xdc   : > { %v2137_v19 = vsub.f32 %v2007_v36, %v464_v16  ;;  %560 = vadd.xlane.f32.xlu0 %v526_v13  ;;  %558 = vadd.xlane.f32.xlu1 %v525_v17  ;;  %v2140_v20 = vsub.f32 %v2010_v37, %v465_v18 }
  0xdd   : > { %v408_v22 = vpop.xlane.xlu0 %407  ;;  %v410_v23 = vpop.xlane.xlu1 %409 }
  0xde   : > { %v466_v24 = vmul.f32 0.0078125, %v408_v22  ;;  %v528_v25 = vmul.f32 %v2137_v19, %v2137_v19  ;;  %v467_v26 = vmul.f32 0.0078125, %v410_v23  ;;  %v529_v29 = vmul.f32 %v2140_v20, %v2140_v20 }
  0xe0   : > { %v2147_v27 = vsub.f32 %v2015_v38, %v466_v24  ;;  %562 = vadd.xlane.f32.xlu1 %v527_v21  ;;  %564 = vadd.xlane.f32.xlu0 %v528_v25  ;;  %v2150_v28 = vsub.f32 %v2018_v39, %v467_v26 }
  0xe1   : > { %v412_v30 = vpop.xlane.xlu0 %411  ;;  %v414_v31 = vpop.xlane.xlu1 %413 }
  0xe2   : > { %v468_v32 = vmul.f32 0.0078125, %v412_v30  ;;  %v530_v33 = vmul.f32 %v2147_v27, %v2147_v27  ;;  %v469_v34 = vmul.f32 0.0078125, %v414_v31  ;;  %v531_v37 = vmul.f32 %v2150_v28, %v2150_v28 }
  0xe4   : > { %v2157_v35 = vsub.f32 %v2023_v40, %v468_v32  ;;  %566 = vadd.xlane.f32.xlu1 %v529_v29  ;;  %568 = vadd.xlane.f32.xlu0 %v530_v33  ;;  %v2160_v36 = vsub.f32 %v2026_v41, %v469_v34 }
  0xe5   : > { %v416_v38 = vpop.xlane.xlu0 %415  ;;  %v418_v39 = vpop.xlane.xlu1 %417 }
  0xe6   : > { %v470_v0 = vmul.f32 0.0078125, %v416_v38  ;;  %v532_v1 = vmul.f32 %v2157_v35, %v2157_v35  ;;  %v471_v2 = vmul.f32 0.0078125, %v418_v39  ;;  %v533_v41 = vmul.f32 %v2160_v36, %v2160_v36 }
  0xe8   : > { %v2167_v3 = vsub.f32 %v2031_v42, %v470_v0  ;;  %570 = vadd.xlane.f32.xlu1 %v531_v37  ;;  %572 = vadd.xlane.f32.xlu0 %v532_v1  ;;  %v2170_v40 = vsub.f32 %v2034_v43, %v471_v2 }
  0xe9   : > { %v420_v6 = vpop.xlane.xlu0 %419  ;;  %v422_v7 = vpop.xlane.xlu1 %421 }
  0xea   : > { %v472_v8 = vmul.f32 0.0078125, %v420_v6  ;;  %v534_v9 = vmul.f32 %v2167_v3, %v2167_v3  ;;  %v473_v10 = vmul.f32 0.0078125, %v422_v7  ;;  %v535_v43 = vmul.f32 %v2170_v40, %v2170_v40 }
  0xec   : > { %v2177_v13 = vsub.f32 %v2039_v44, %v472_v8  ;;  %574 = vadd.xlane.f32.xlu1 %v533_v41  ;;  %576 = vadd.xlane.f32.xlu0 %v534_v9  ;;  %v2180_v42 = vsub.f32 %v2042_v45, %v473_v10 }
  0xed   : > { %v424_v14 = vpop.xlane.xlu0 %423  ;;  %v426_v15 = vpop.xlane.xlu1 %425 }
  0xee   : > { %v474_v16 = vmul.f32 0.0078125, %v424_v14  ;;  %v536_v17 = vmul.f32 %v2177_v13, %v2177_v13  ;;  %v475_v18 = vmul.f32 0.0078125, %v426_v15  ;;  %v537_v45 = vmul.f32 %v2180_v42, %v2180_v42 }
  0xf0   : > { %v2187_v21 = vsub.f32 %v2047_v46, %v474_v16  ;;  %578 = vadd.xlane.f32.xlu1 %v535_v43  ;;  %580 = vadd.xlane.f32.xlu0 %v536_v17  ;;  %v2190_v44 = vsub.f32 %v2050_v47, %v475_v18 }
  0xf1   : > { %v428_v22 = vpop.xlane.xlu0 %427  ;;  %v430_v23 = vpop.xlane.xlu1 %429 }
  0xf2   : > { %v476_v24 = vmul.f32 0.0078125, %v428_v22  ;;  %v538_v25 = vmul.f32 %v2187_v21, %v2187_v21  ;;  %v477_v26 = vmul.f32 0.0078125, %v430_v23  ;;  %v539_v47 = vmul.f32 %v2190_v44, %v2190_v44 }
  0xf4   : > { %v2197_v29 = vsub.f32 %v2055_v48, %v476_v24  ;;  %582 = vadd.xlane.f32.xlu1 %v537_v45  ;;  %584 = vadd.xlane.f32.xlu0 %v538_v25  ;;  %v2200_v46 = vsub.f32 %v2058_v49, %v477_v26 }
  0xf5   : > { %v432_v30 = vpop.xlane.xlu0 %431  ;;  %v434_v31 = vpop.xlane.xlu1 %433 }
  0xf6   : > { %v478_v32 = vmul.f32 0.0078125, %v432_v30  ;;  %v540_v33 = vmul.f32 %v2197_v29, %v2197_v29  ;;  %v479_v34 = vmul.f32 0.0078125, %v434_v31  ;;  %v541_v49 = vmul.f32 %v2200_v46, %v2200_v46 }
  0xf8   : > { %v2207_v37 = vsub.f32 %v2063_v50, %v478_v32  ;;  %586 = vadd.xlane.f32.xlu1 %v539_v47  ;;  %588 = vadd.xlane.f32.xlu0 %v540_v33  ;;  %v2210_v48 = vsub.f32 %v2066_v51, %v479_v34 }
  0xf9   : > { %v436_v38 = vpop.xlane.xlu0 %435  ;;  %v438_v39 = vpop.xlane.xlu1 %437 }
  0xfa   : > { %v480_v0 = vmul.f32 0.0078125, %v436_v38  ;;  %v542_v1 = vmul.f32 %v2207_v37, %v2207_v37  ;;  %v481_v2 = vmul.f32 0.0078125, %v438_v39  ;;  %v543_v51 = vmul.f32 %v2210_v48, %v2210_v48 }
  0xfc   : > { %v2217_v41 = vsub.f32 %v2071_v52, %v480_v0  ;;  %590 = vadd.xlane.f32.xlu1 %v541_v49  ;;  %592 = vadd.xlane.f32.xlu0 %v542_v1  ;;  %v2220_v50 = vsub.f32 %v2074_v53, %v481_v2 }
  0xfd   : > { %v440_v6 = vpop.xlane.xlu0 %439  ;;  %v442_v7 = vpop.xlane.xlu1 %441 }
  0xfe   : > { %v482_v8 = vmul.f32 0.0078125, %v440_v6  ;;  %v544_v9 = vmul.f32 %v2217_v41, %v2217_v41  ;;  %v483_v10 = vmul.f32 0.0078125, %v442_v7  ;;  %v545_v53 = vmul.f32 %v2220_v50, %v2220_v50 }
 0x100   : > { %v2227_v43 = vsub.f32 %v2079_v54, %v482_v8  ;;  %594 = vadd.xlane.f32.xlu1 %v543_v51  ;;  %596 = vadd.xlane.f32.xlu0 %v544_v9  ;;  %v2230_v52 = vsub.f32 %v2082_v55, %v483_v10 }
 0x101   : > { %v444_v14 = vpop.xlane.xlu0 %443  ;;  %v446_v15 = vpop.xlane.xlu1 %445 }
 0x102   : > { %v484_v16 = vmul.f32 0.0078125, %v444_v14  ;;  %v546_v17 = vmul.f32 %v2227_v43, %v2227_v43  ;;  %v485_v18 = vmul.f32 0.0078125, %v446_v15  ;;  %v547_v55 = vmul.f32 %v2230_v52, %v2230_v52 }
 0x104   : > { %v2237_v45 = vsub.f32 %v2087_v56, %v484_v16  ;;  %598 = vadd.xlane.f32.xlu1 %v545_v53  ;;  %600 = vadd.xlane.f32.xlu0 %v546_v17  ;;  %v2240_v54 = vsub.f32 %v2090_v57, %v485_v18 }
 0x105   : > { %v448_v22 = vpop.xlane.xlu0 %447  ;;  %v450_v23 = vpop.xlane.xlu1 %449 }
 0x106   : > { %v486_v24 = vmul.f32 0.0078125, %v448_v22  ;;  %v548_v25 = vmul.f32 %v2237_v45, %v2237_v45  ;;  %v487_v26 = vmul.f32 0.0078125, %v450_v23  ;;  %v549_v57 = vmul.f32 %v2240_v54, %v2240_v54 }
 0x108   : > { %v2247_v47 = vsub.f32 %v2095_v58, %v486_v24  ;;  %602 = vadd.xlane.f32.xlu1 %v547_v55  ;;  %604 = vadd.xlane.f32.xlu0 %v548_v25  ;;  %v2250_v56 = vsub.f32 %v2098_v59, %v487_v26 }
 0x109   : > { %v452_v30 = vpop.xlane.xlu0 %451  ;;  %v454_v31 = vpop.xlane.xlu1 %453 }
 0x10a   : > { %v488_v32 = vmul.f32 0.0078125, %v452_v30  ;;  %v550_v33 = vmul.f32 %v2247_v47, %v2247_v47  ;;  %v489_v34 = vmul.f32 0.0078125, %v454_v31  ;;  %v551_v59 = vmul.f32 %v2250_v56, %v2250_v56 }
 0x10c   : > { %v2257_v49 = vsub.f32 %v2103_v60, %v488_v32  ;;  %606 = vadd.xlane.f32.xlu1 %v549_v57  ;;  %608 = vadd.xlane.f32.xlu0 %v550_v33  ;;  %v2260_v58 = vsub.f32 %v2106_v61, %v489_v34  ;;  %v2281_v32 = vld [vmem:[%s2750_s1] ss:$0 sm:$0xff] }
 0x10d   : > { %v456_v38 = vpop.xlane.xlu0 %455  ;;  %v458_v39 = vpop.xlane.xlu1 %457 }
 0x10e   : > { %v490_v0 = vmul.f32 0.0078125, %v456_v38  ;;  %v552_v1 = vmul.f32 %v2257_v49, %v2257_v49  ;;  %v491_v2 = vmul.f32 0.0078125, %v458_v39  ;;  %v553_v61 = vmul.f32 %v2260_v58, %v2260_v58 }
 0x110   : > { %v2267_v51 = vsub.f32 %v2111_v62, %v490_v0  ;;  %610 = vadd.xlane.f32.xlu1 %v551_v59  ;;  %612 = vadd.xlane.f32.xlu0 %v552_v1  ;;  %v2270_v60 = vsub.f32 %v2114_v63, %v491_v2  ;;  %v2287_v0 = vld [vmem:[%s2751_s2] ss:$0 sm:$0xff] }
 0x112   : > { %v554_v6 = vmul.f32 %v2267_v51, %v2267_v51  ;;  %v555_v7 = vmul.f32 %v2270_v60, %v2270_v60 }
 0x114   : > { %614 = vadd.xlane.f32.xlu1 %v553_v61  ;;  %616 = vadd.xlane.f32.xlu0 %v554_v6 }
 0x118   : > { %618 = vadd.xlane.f32.xlu1 %v555_v7 }
 0x165   : > { %v557_v8 = vpop.xlane.xlu0 %556 }
 0x166   : > { %v620_v62 = vmul.f32 0.0078125, %v557_v8 }
 0x168   : > { %v652_v9 = vadd.f32 1e-05, %v620_v62 }
 0x169   : > { %v559_v10 = vpop.xlane.xlu1 %558  ;;  %v561_v53 = vpop.xlane.xlu0 %560 }
 0x16a   : > { %1649 = vrsqrt.f32 %v652_v9  ;;  %v621_v63 = vmul.f32 0.0078125, %v559_v10  ;;  %v622_v14 = vmul.f32 0.0078125, %v561_v53 }
 0x16c   : > { %v653_v15 = vadd.f32 1e-05, %v621_v63  ;;  %v654_v16 = vadd.f32 1e-05, %v622_v14 }
 0x16d   : > { %v563_v17 = vpop.xlane.xlu1 %562  ;;  %v565_v18 = vpop.xlane.xlu0 %564 }
 0x16e   : > { %1651 = vrsqrt.f32 %v653_v15  ;;  %v623_v55 = vmul.f32 0.0078125, %v563_v17  ;;  %v624_v22 = vmul.f32 0.0078125, %v565_v18 }
 0x16f   : > { %1653 = vrsqrt.f32 %v654_v16 }
 0x170   : > { %v655_v23 = vadd.f32 1e-05, %v623_v55  ;;  %v656_v24 = vadd.f32 1e-05, %v624_v22 }
 0x171   : > { %v567_v25 = vpop.xlane.xlu1 %566  ;;  %v569_v26 = vpop.xlane.xlu0 %568 }
 0x172   : > { %1655 = vrsqrt.f32 %v655_v23  ;;  %v625_v57 = vmul.f32 0.0078125, %v567_v25  ;;  %v626_v30 = vmul.f32 0.0078125, %v569_v26 }
 0x173   : > { %1657 = vrsqrt.f32 %v656_v24 }
 0x174   : > { %v1650_v31 = vpop.eup %1649  ;;  %v657_v33 = vadd.f32 1e-05, %v625_v57  ;;  %v658_v34 = vadd.f32 1e-05, %v626_v30 }
 0x175   : > { %v716_v59 = vmul.f32 %v1650_v31, %v2119_v4  ;;  %v571_v38 = vpop.xlane.xlu1 %570  ;;  %v573_v39 = vpop.xlane.xlu0 %572 }
 0x176   : > { %1659 = vrsqrt.f32 %v657_v33  ;;  %v627_v1 = vmul.f32 0.0078125, %v571_v38  ;;  %v628_v2 = vmul.f32 0.0078125, %v573_v39 }
 0x177   : > { %v755_v61 = vmul.f32 %v2281_v32, %v716_v59  ;;  %1661 = vrsqrt.f32 %v658_v34 }
 0x178   : > { %v1652_v6 = vpop.eup %1651  ;;  %v659_v7 = vadd.f32 1e-05, %v627_v1  ;;  %v660_v8 = vadd.f32 1e-05, %v628_v2 }
 0x179   : > { %v1654_v62 = vpop.eup %1653  ;;  %v794_v9 = vadd.f32 %v2287_v0, %v755_v61  ;;  %v717_v4 = vmul.f32 %v1652_v6, %v2127_v11  ;;  %v575_v10 = vpop.xlane.xlu1 %574 }
 0x17a   : > { %v577_v53 = vpop.xlane.xlu0 %576  ;;  %v718_v63 = vmul.f32 %v1654_v62, %v2122_v5  ;;  %1663 = vrsqrt.f32 %v659_v7  ;;  %v629_v14 = vmul.f32 0.0078125, %v575_v10 }
 0x17b   : > { %v630_v15 = vmul.f32 0.0078125, %v577_v53  ;;  %826 = vst [vmem:[#allocation2] sm:$0xff] %v794_v9  ;;  %v756_v16 = vmul.f32 %v2281_v32, %v717_v4  ;;  %1665 = vrsqrt.f32 %v660_v8 }
 0x17c   : > { %v1656_v17 = vpop.eup %1655  ;;  %v757_v18 = vmul.f32 %v2281_v32, %v718_v63  ;;  %v661_v55 = vadd.f32 1e-05, %v629_v14 }
 0x17d   : > { %v662_v22 = vadd.f32 1e-05, %v630_v15  ;;  %v1658_v23 = vpop.eup %1657  ;;  %v795_v24 = vadd.f32 %v2287_v0, %v756_v16  ;;  %v719_v11 = vmul.f32 %v1656_v17, %v2130_v12  ;;  %v579_v25 = vpop.xlane.xlu1 %578 }
 0x17e   : > { %v581_v26 = vpop.xlane.xlu0 %580  ;;  %v796_v5 = vadd.f32 %v2287_v0, %v757_v18  ;;  %v720_v57 = vmul.f32 %v1658_v23, %v2137_v19  ;;  %1667 = vrsqrt.f32 %v661_v55  ;;  %v631_v30 = vmul.f32 0.0078125, %v579_v25 }
 0x17f   : > { %827 = vst [vmem:[#allocation2 + $0x8] sm:$0xff] %v795_v24  ;;  %v758_v31 = vmul.f32 %v2281_v32, %v719_v11  ;;  %1669 = vrsqrt.f32 %v662_v22  ;;  %v632_v33 = vmul.f32 0.0078125, %v581_v26 }
 0x180   : > { %v1660_v34 = vpop.eup %1659  ;;  %828 = vst [vmem:[#allocation2 + $0x10] sm:$0xff] %v796_v5  ;;  %v759_v59 = vmul.f32 %v2281_v32, %v720_v57  ;;  %v663_v38 = vadd.f32 1e-05, %v631_v30 }
 0x181   : > { %v1662_v39 = vpop.eup %1661  ;;  %v797_v12 = vadd.f32 %v2287_v0, %v758_v31  ;;  %v721_v1 = vmul.f32 %v1660_v34, %v2140_v20  ;;  %v664_v2 = vadd.f32 1e-05, %v632_v33  ;;  %v583_v61 = vpop.xlane.xlu1 %582 }
 0x182   : > { %v585_v19 = vpop.xlane.xlu0 %584  ;;  %v798_v6 = vadd.f32 %v2287_v0, %v759_v59  ;;  %v722_v7 = vmul.f32 %v1662_v39, %v2147_v27  ;;  %1671 = vrsqrt.f32 %v663_v38  ;;  %v633_v8 = vmul.f32 0.0078125, %v583_v61 }
 0x183   : > { %829 = vst [vmem:[#allocation2 + $0x18] sm:$0xff] %v797_v12  ;;  %v760_v62 = vmul.f32 %v2281_v32, %v721_v1  ;;  %1673 = vrsqrt.f32 %v664_v2  ;;  %v634_v9 = vmul.f32 0.0078125, %v585_v19 }
 0x184   : > { %v1664_v4 = vpop.eup %1663  ;;  %830 = vst [vmem:[#allocation2 + $0x20] sm:$0xff] %v798_v6  ;;  %v761_v10 = vmul.f32 %v2281_v32, %v722_v7  ;;  %v665_v53 = vadd.f32 1e-05, %v633_v8 }
 0x185   : > { %v1666_v20 = vpop.eup %1665  ;;  %v799_v63 = vadd.f32 %v2287_v0, %v760_v62  ;;  %v723_v14 = vmul.f32 %v1664_v4, %v2150_v28  ;;  %v666_v15 = vadd.f32 1e-05, %v634_v9  ;;  %v587_v16 = vpop.xlane.xlu1 %586 }
 0x186   : > { %v589_v27 = vpop.xlane.xlu0 %588  ;;  %v800_v17 = vadd.f32 %v2287_v0, %v761_v10  ;;  %v724_v18 = vmul.f32 %v1666_v20, %v2157_v35  ;;  %1675 = vrsqrt.f32 %v665_v53  ;;  %v635_v55 = vmul.f32 0.0078125, %v587_v16 }
 0x187   : > { %831 = vst [vmem:[#allocation2 + $0x28] sm:$0xff] %v799_v63  ;;  %v762_v22 = vmul.f32 %v2281_v32, %v723_v14  ;;  %1677 = vrsqrt.f32 %v666_v15  ;;  %v636_v23 = vmul.f32 0.0078125, %v589_v27 }
 0x188   : > { %v1668_v24 = vpop.eup %1667  ;;  %832 = vst [vmem:[#allocation2 + $0x30] sm:$0xff] %v800_v17  ;;  %v763_v11 = vmul.f32 %v2281_v32, %v724_v18  ;;  %v667_v25 = vadd.f32 1e-05, %v635_v55 }
 0x189   : > { %v1670_v28 = vpop.eup %1669  ;;  %v801_v26 = vadd.f32 %v2287_v0, %v762_v22  ;;  %v725_v5 = vmul.f32 %v1668_v24, %v2160_v36  ;;  %v668_v57 = vadd.f32 1e-05, %v636_v23  ;;  %v591_v30 = vpop.xlane.xlu1 %590 }
 0x18a   : > { %v593_v35 = vpop.xlane.xlu0 %592  ;;  %v802_v31 = vadd.f32 %v2287_v0, %v763_v11  ;;  %v726_v33 = vmul.f32 %v1670_v28, %v2167_v3  ;;  %1679 = vrsqrt.f32 %v667_v25  ;;  %v637_v34 = vmul.f32 0.0078125, %v591_v30 }
 0x18b   : > { %833 = vst [vmem:[#allocation2 + $0x38] sm:$0xff] %v801_v26  ;;  %v764_v59 = vmul.f32 %v2281_v32, %v725_v5  ;;  %1681 = vrsqrt.f32 %v668_v57  ;;  %v638_v38 = vmul.f32 0.0078125, %v593_v35 }
 0x18c   : > { %v1672_v39 = vpop.eup %1671  ;;  %834 = vst [vmem:[#allocation2 + $0x40] sm:$0xff] %v802_v31  ;;  %v765_v12 = vmul.f32 %v2281_v32, %v726_v33  ;;  %v669_v1 = vadd.f32 1e-05, %v637_v34 }
 0x18d   : > { %v1674_v36 = vpop.eup %1673  ;;  %v803_v2 = vadd.f32 %v2287_v0, %v764_v59  ;;  %v727_v61 = vmul.f32 %v1672_v39, %v2170_v40  ;;  %v670_v19 = vadd.f32 1e-05, %v638_v38  ;;  %v595_v6 = vpop.xlane.xlu1 %594 }
 0x18e   : > { %v597_v3 = vpop.xlane.xlu0 %596  ;;  %v804_v7 = vadd.f32 %v2287_v0, %v765_v12  ;;  %v728_v8 = vmul.f32 %v1674_v36, %v2177_v13  ;;  %1683 = vrsqrt.f32 %v669_v1  ;;  %v639_v62 = vmul.f32 0.0078125, %v595_v6 }
 0x18f   : > { %835 = vst [vmem:[#allocation2 + $0x48] sm:$0xff] %v803_v2  ;;  %v766_v9 = vmul.f32 %v2281_v32, %v727_v61  ;;  %1685 = vrsqrt.f32 %v670_v19  ;;  %v640_v4 = vmul.f32 0.0078125, %v597_v3 }
 0x190   : > { %v1676_v10 = vpop.eup %1675  ;;  %836 = vst [vmem:[#allocation2 + $0x50] sm:$0xff] %v804_v7  ;;  %v767_v53 = vmul.f32 %v2281_v32, %v728_v8  ;;  %v671_v20 = vadd.f32 1e-05, %v639_v62 }
 0x191   : > { %v1678_v40 = vpop.eup %1677  ;;  %v805_v63 = vadd.f32 %v2287_v0, %v766_v9  ;;  %v729_v14 = vmul.f32 %v1676_v10, %v2180_v42  ;;  %v672_v15 = vadd.f32 1e-05, %v640_v4  ;;  %v599_v16 = vpop.xlane.xlu1 %598 }
 0x192   : > { %v601_v13 = vpop.xlane.xlu0 %600  ;;  %v806_v27 = vadd.f32 %v2287_v0, %v767_v53  ;;  %v730_v17 = vmul.f32 %v1678_v40, %v2187_v21  ;;  %1687 = vrsqrt.f32 %v671_v20  ;;  %v641_v18 = vmul.f32 0.0078125, %v599_v16 }
 0x193   : > { %837 = vst [vmem:[#allocation2 + $0x58] sm:$0xff] %v805_v63  ;;  %v768_v55 = vmul.f32 %v2281_v32, %v729_v14  ;;  %1689 = vrsqrt.f32 %v672_v15  ;;  %v642_v22 = vmul.f32 0.0078125, %v601_v13 }
 0x194   : > { %v1680_v23 = vpop.eup %1679  ;;  %838 = vst [vmem:[#allocation2 + $0x60] sm:$0xff] %v806_v27  ;;  %v769_v24 = vmul.f32 %v2281_v32, %v730_v17  ;;  %v673_v11 = vadd.f32 1e-05, %v641_v18 }
 0x195   : > { %v1682_v42 = vpop.eup %1681  ;;  %v807_v25 = vadd.f32 %v2287_v0, %v768_v55  ;;  %v731_v28 = vmul.f32 %v1680_v23, %v2190_v44  ;;  %v674_v26 = vadd.f32 1e-05, %v642_v22  ;;  %v603_v5 = vpop.xlane.xlu1 %602 }
 0x196   : > { %v605_v21 = vpop.xlane.xlu0 %604  ;;  %v808_v57 = vadd.f32 %v2287_v0, %v769_v24  ;;  %v732_v30 = vmul.f32 %v1682_v42, %v2197_v29  ;;  %1691 = vrsqrt.f32 %v673_v11  ;;  %v643_v35 = vmul.f32 0.0078125, %v603_v5 }
 0x197   : > { %839 = vst [vmem:[#allocation2 + $0x68] sm:$0xff] %v807_v25  ;;  %v770_v31 = vmul.f32 %v2281_v32, %v731_v28  ;;  %1693 = vrsqrt.f32 %v674_v26  ;;  %v644_v33 = vmul.f32 0.0078125, %v605_v21 }
 0x198   : > { %v1684_v34 = vpop.eup %1683  ;;  %840 = vst [vmem:[#allocation2 + $0x70] sm:$0xff] %v808_v57  ;;  %v771_v59 = vmul.f32 %v2281_v32, %v732_v30  ;;  %v675_v38 = vadd.f32 1e-05, %v643_v35 }
 0x199   : > { %v1686_v44 = vpop.eup %1685  ;;  %v809_v39 = vadd.f32 %v2287_v0, %v770_v31  ;;  %v733_v12 = vmul.f32 %v1684_v34, %v2200_v46  ;;  %v676_v1 = vadd.f32 1e-05, %v644_v33  ;;  %v607_v36 = vpop.xlane.xlu1 %606 }
 0x19a   : > { %v609_v29 = vpop.xlane.xlu0 %608  ;;  %v810_v2 = vadd.f32 %v2287_v0, %v771_v59  ;;  %v734_v61 = vmul.f32 %v1686_v44, %v2207_v37  ;;  %1695 = vrsqrt.f32 %v675_v38  ;;  %v645_v19 = vmul.f32 0.0078125, %v607_v36 }
 0x19b   : > { %841 = vst [vmem:[#allocation2 + $0x78] sm:$0xff] %v809_v39  ;;  %v772_v6 = vmul.f32 %v2281_v32, %v733_v12  ;;  %1697 = vrsqrt.f32 %v676_v1  ;;  %v646_v3 = vmul.f32 0.0078125, %v609_v29 }
 0x19c   : > { %v1688_v7 = vpop.eup %1687  ;;  %842 = vst [vmem:[#allocation2 + $0x80] sm:$0xff] %v810_v2  ;;  %v773_v8 = vmul.f32 %v2281_v32, %v734_v61  ;;  %v677_v62 = vadd.f32 1e-05, %v645_v19 }
 0x19d   : > { %v1690_v46 = vpop.eup %1689  ;;  %v811_v9 = vadd.f32 %v2287_v0, %v772_v6  ;;  %v735_v4 = vmul.f32 %v1688_v7, %v2210_v48  ;;  %v678_v10 = vadd.f32 1e-05, %v646_v3  ;;  %v611_v53 = vpop.xlane.xlu1 %610 }
 0x19e   : > { %v613_v37 = vpop.xlane.xlu0 %612  ;;  %v812_v20 = vadd.f32 %v2287_v0, %v773_v8  ;;  %v736_v40 = vmul.f32 %v1690_v46, %v2217_v41  ;;  %1699 = vrsqrt.f32 %v677_v62  ;;  %v647_v63 = vmul.f32 0.0078125, %v611_v53 }
 0x19f   : > { %843 = vst [vmem:[#allocation2 + $0x88] sm:$0xff] %v811_v9  ;;  %v774_v14 = vmul.f32 %v2281_v32, %v735_v4  ;;  %1701 = vrsqrt.f32 %v678_v10  ;;  %v648_v15 = vmul.f32 0.0078125, %v613_v37 }
 0x1a0   : > { %v1692_v16 = vpop.eup %1691  ;;  %844 = vst [vmem:[#allocation2 + $0x90] sm:$0xff] %v812_v20  ;;  %v775_v13 = vmul.f32 %v2281_v32, %v736_v40  ;;  %v679_v27 = vadd.f32 1e-05, %v647_v63 }
 0x1a1   : > { %v1694_v48 = vpop.eup %1693  ;;  %v813_v17 = vadd.f32 %v2287_v0, %v774_v14  ;;  %v737_v18 = vmul.f32 %v1692_v16, %v2220_v50  ;;  %v680_v55 = vadd.f32 1e-05, %v648_v15  ;;  %v615_v22 = vpop.xlane.xlu1 %614 }
 0x1a2   : > { %v617_v41 = vpop.xlane.xlu0 %616  ;;  %v814_v23 = vadd.f32 %v2287_v0, %v775_v13  ;;  %v738_v24 = vmul.f32 %v1694_v48, %v2227_v43  ;;  %1703 = vrsqrt.f32 %v679_v27  ;;  %v649_v11 = vmul.f32 0.0078125, %v615_v22 }
 0x1a3   : > { %845 = vst [vmem:[#allocation2 + $0x98] sm:$0xff] %v813_v17  ;;  %v776_v42 = vmul.f32 %v2281_v32, %v737_v18  ;;  %1705 = vrsqrt.f32 %v680_v55  ;;  %v650_v25 = vmul.f32 0.0078125, %v617_v41 }
 0x1a4   : > { %v1696_v28 = vpop.eup %1695  ;;  %846 = vst [vmem:[#allocation2 + $0xa0] sm:$0xff] %v814_v23  ;;  %v777_v26 = vmul.f32 %v2281_v32, %v738_v24  ;;  %v681_v5 = vadd.f32 1e-05, %v649_v11 }
 0x1a5   : > { %v1698_v50 = vpop.eup %1697  ;;  %v815_v21 = vadd.f32 %v2287_v0, %v776_v42  ;;  %v739_v57 = vmul.f32 %v1696_v28, %v2230_v52  ;;  %v682_v30 = vadd.f32 1e-05, %v650_v25  ;;  %v619_v35 = vpop.xlane.xlu1 %618 }
 0x1a6   : > { %v816_v43 = vadd.f32 %v2287_v0, %v777_v26  ;;  %v740_v31 = vmul.f32 %v1698_v50, %v2237_v45  ;;  %1707 = vrsqrt.f32 %v681_v5  ;;  %v651_v33 = vmul.f32 0.0078125, %v619_v35 }
 0x1a7   : > { %847 = vst [vmem:[#allocation2 + $0xa8] sm:$0xff] %v815_v21  ;;  %v778_v34 = vmul.f32 %v2281_v32, %v739_v57  ;;  %1709 = vrsqrt.f32 %v682_v30 }
 0x1a8   : > { %v1700_v59 = vpop.eup %1699  ;;  %848 = vst [vmem:[#allocation2 + $0xb0] sm:$0xff] %v816_v43  ;;  %v779_v38 = vmul.f32 %v2281_v32, %v740_v31  ;;  %v683_v44 = vadd.f32 1e-05, %v651_v33 }
 0x1a9   : > { %v1702_v39 = vpop.eup %1701  ;;  %v817_v52 = vadd.f32 %v2287_v0, %v778_v34  ;;  %v741_v12 = vmul.f32 %v1700_v59, %v2240_v54 }
 0x1aa   : > { %v818_v1 = vadd.f32 %v2287_v0, %v779_v38  ;;  %v742_v45 = vmul.f32 %v1702_v39, %v2247_v47  ;;  %1711 = vrsqrt.f32 %v683_v44 }
 0x1ab   : > { %849 = vst [vmem:[#allocation2 + $0xb8] sm:$0xff] %v817_v52  ;;  %v780_v36 = vmul.f32 %v2281_v32, %v741_v12 }
 0x1ac   : > { %v1704_v29 = vpop.eup %1703  ;;  %850 = vst [vmem:[#allocation2 + $0xc0] sm:$0xff] %v818_v1  ;;  %v781_v2 = vmul.f32 %v2281_v32, %v742_v45 }
 0x1ad   : > { %v1706_v61 = vpop.eup %1705  ;;  %v819_v19 = vadd.f32 %v2287_v0, %v780_v36  ;;  %v743_v6 = vmul.f32 %v1704_v29, %v2250_v56 }
 0x1ae   : > { %v820_v3 = vadd.f32 %v2287_v0, %v781_v2  ;;  %v744_v54 = vmul.f32 %v1706_v61, %v2257_v49 }
 0x1af   : > { %851 = vst [vmem:[#allocation2 + $0xc8] sm:$0xff] %v819_v19  ;;  %v782_v47 = vmul.f32 %v2281_v32, %v743_v6 }
 0x1b0   : > { %v1708_v7 = vpop.eup %1707  ;;  %852 = vst [vmem:[#allocation2 + $0xd0] sm:$0xff] %v820_v3  ;;  %v783_v8 = vmul.f32 %v2281_v32, %v744_v54 }
 0x1b1   : > { %v1710_v62 = vpop.eup %1709  ;;  %v821_v46 = vadd.f32 %v2287_v0, %v782_v47  ;;  %v745_v9 = vmul.f32 %v1708_v7, %v2260_v58 }
 0x1b2   : > { %v822_v4 = vadd.f32 %v2287_v0, %v783_v8  ;;  %v746_v56 = vmul.f32 %v1710_v62, %v2267_v51 }
 0x1b3   : > { %853 = vst [vmem:[#allocation2 + $0xd8] sm:$0xff] %v821_v46  ;;  %v784_v10 = vmul.f32 %v2281_v32, %v745_v9 }
 0x1b4   : > { %v1712_v49 = vpop.eup %1711  ;;  %854 = vst [vmem:[#allocation2 + $0xe0] sm:$0xff] %v822_v4  ;;  %v785_v53 = vmul.f32 %v2281_v32, %v746_v56 }
 0x1b5   : > { %v823_v37 = vadd.f32 %v2287_v0, %v784_v10  ;;  %v747_v20 = vmul.f32 %v1712_v49, %v2270_v60 }
 0x1b6   : > { %v824_v40 = vadd.f32 %v2287_v0, %v785_v53 }
 0x1b7   : > { %855 = vst [vmem:[#allocation2 + $0xe8] sm:$0xff] %v823_v37  ;;  %v786_v58 = vmul.f32 %v2281_v32, %v747_v20 }
 0x1b8   : > { %856 = vst [vmem:[#allocation2 + $0xf0] sm:$0xff] %v824_v40 }
 0x1b9   : > { %v825_v63 = vadd.f32 %v2287_v0, %v786_v58 }
 0x1bb   : > { %857 = vst [vmem:[#allocation2 + $0xf8] sm:$0xff] %v825_v63 }
 0x1bc PF: > { %v891_v51 = vld [vmem:[%s1985_s7 + $0x8] sm:$0xff]  ;;  %v893_v60 = vld [vmem:[%s1985_s7 + $0x18] sm:$0xff]  ;;  %v890_v14 = vld [vmem:[%s1985_s7] sm:$0xff]  ;;  %v1785_v0 = vmov 0.0   ;;  %s1527_s15 = sshll.u32 (%p1883_p9), %s1771_s23, 7 }
 0x1bd   : > { %v1528_v15 = vpack.c.bf16 %v893_v60, %v891_v51  ;;  %v892_v32 = vld [vmem:[%s1985_s7 + $0x10] sm:$0xff]  ;;  %v895_v16 = vld [vmem:[%s1985_s7 + $0x28] sm:$0xff]  ;;  %v897_v13 = vld [vmem:[%s1985_s7 + $0x38] sm:$0xff]  ;;  %998 = vmatprep.mubr.f32.mxu0 %v1785_v0  ;;  %1094 = vmatprep.mubr.f32.mxu1 %v1785_v0  ;;  %s1265_s11 = sadd.s32 (%p1883_p9), %s1527_s15, %s1970_s14 }
 0x1be   : > { %v1530_v27 = vpack.c.bf16 %v892_v32, %v890_v14  ;;  %v1532_v48 = vpack.c.bf16 %v897_v13, %v895_v16  ;;  %v894_v17 = vld [vmem:[%s1985_s7 + $0x20] sm:$0xff]  ;;  %v896_v18 = vld [vmem:[%s1985_s7 + $0x30] sm:$0xff]  ;;  %v899_v55 = vld [vmem:[%s1985_s7 + $0x48] sm:$0xff]  ;;  %s1523_s27 = sshll.u32 (%p1883_p9), %s1265_s11, 3 }
 0x1bf   : > { %1529 = vmatprep.subr.bf16.mxu0 %v1528_v15  ;;  %1560 = vmatprep.subr.bf16.mxu1 %v1528_v15  ;;  %v901_v22 = vld [vmem:[%s1985_s7 + $0x58] sm:$0xff]  ;;  %v1534_v41 = vpack.c.bf16 %v896_v18, %v894_v17  ;;  %v898_v24 = vld [vmem:[%s1985_s7 + $0x40] sm:$0xff]  ;;  %v900_v11 = vld [vmem:[%s1985_s7 + $0x50] sm:$0xff]  ;;  %s2601_s20 = scalar_lea.vmem (%p1883_p9), %s2754_s5, %s1523_s27 }
 0x1c0   : > { %1531 = vmatpush1.bf16.msra.mxu0 %v1530_v27  ;;  %1568 = vmatpush1.bf16.msra.mxu1 %v1530_v27  ;;  %v1536_v23 = vpack.c.bf16 %v901_v22, %v899_v55  ;;  %v903_v42 = vld [vmem:[%s1985_s7 + $0x68] sm:$0xff]  ;;  %v905_v25 = vld [vmem:[%s1985_s7 + $0x78] sm:$0xff]  ;;  %v1538_v28 = vpack.c.bf16 %v900_v11, %v898_v24  ;;  %v902_v5 = vld [vmem:[%s1985_s7 + $0x60] sm:$0xff] }
 0x1c1   : > { %1533 = vmatprep.subr.bf16.mxu0 %v1532_v48  ;;  %1561 = vmatprep.subr.bf16.mxu1 %v1532_v48  ;;  %v1540_v26 = vpack.c.bf16 %v905_v25, %v903_v42  ;;  %v904_v50 = vld [vmem:[%s1985_s7 + $0x70] sm:$0xff]  ;;  %v907_v21 = vld [vmem:[%s1985_s7 + $0x88] sm:$0xff]  ;;  %v909_v57 = vld [vmem:[%s1985_s7 + $0x98] sm:$0xff]  ;;  %v924_v42 = vlaneseq }
 0x1c2   : > { %v1542_v30 = vpack.c.bf16 %v904_v50, %v902_v5  ;;  %v1544_v35 = vpack.c.bf16 %v909_v57, %v907_v21  ;;  %v906_v43 = vld [vmem:[%s1985_s7 + $0x80] sm:$0xff]  ;;  %v908_v31 = vld [vmem:[%s1985_s7 + $0x90] sm:$0xff]  ;;  %v911_v33 = vld [vmem:[%s1985_s7 + $0xa8] sm:$0xff] }
 0x1c3   : > { %v913_v34 = vld [vmem:[%s1985_s7 + $0xb8] sm:$0xff]  ;;  %v1546_v59 = vpack.c.bf16 %v908_v31, %v906_v43  ;;  %v910_v44 = vld [vmem:[%s1985_s7 + $0xa0] sm:$0xff]  ;;  %v912_v39 = vld [vmem:[%s1985_s7 + $0xb0] sm:$0xff]  ;;  %v925_v25 = vshrl.u32 %v924_v42, 7 }
 0x1c4   : > { %1535 = vmatpush1.bf16.msra.mxu0 %v1534_v41  ;;  %1569 = vmatpush1.bf16.msra.mxu1 %v1534_v41  ;;  %v1548_v38 = vpack.c.bf16 %v913_v34, %v911_v33  ;;  %v915_v52 = vld [vmem:[%s1985_s7 + $0xc8] sm:$0xff]  ;;  %v917_v12 = vld [vmem:[%s1985_s7 + $0xd8] sm:$0xff]  ;;  %v1550_v1 = vpack.c.bf16 %v912_v39, %v910_v44  ;;  %v914_v36 = vld [vmem:[%s1985_s7 + $0xc0] sm:$0xff] }
 0x1c5   : > { %1537 = vmatprep.subr.bf16.mxu0 %v1536_v23  ;;  %1562 = vmatprep.subr.bf16.mxu1 %v1536_v23  ;;  %v1552_v45 = vpack.c.bf16 %v917_v12, %v915_v52  ;;  %v916_v29 = vld [vmem:[%s1985_s7 + $0xd0] sm:$0xff]  ;;  %v919_v2 = vld [vmem:[%s1985_s7 + $0xe8] sm:$0xff]  ;;  %v921_v61 = vld [vmem:[%s1985_s7 + $0xf8] sm:$0xff]  ;;  %v930_v5 = vsub.s32 1, %v925_v25 }
 0x1c6   : > { %v1554_v19 = vpack.c.bf16 %v916_v29, %v914_v36  ;;  %v1556_v6 = vpack.c.bf16 %v921_v61, %v919_v2  ;;  %v918_v3 = vld [vmem:[%s1985_s7 + $0xe0] sm:$0xff]  ;;  %v920_v54 = vld [vmem:[%s1985_s7 + $0xf0] sm:$0xff]  ;;  %v859_v62 = vld [vmem:[#allocation2 + $0x8] sm:$0xff] }
 0x1c7   : > { %v1558_v47 = vpack.c.bf16 %v920_v54, %v918_v3  ;;  %v858_v7 = vld [vmem:[#allocation2] sm:$0xff]  ;;  %v875_v46 = vld [vmem:[#allocation2 + $0x88] sm:$0xff]  ;;  %v860_v9 = vld [vmem:[#allocation2 + $0x10] sm:$0xff] }
 0x1c8   : > { %1539 = vmatpush1.bf16.msra.mxu0 %v1538_v28  ;;  %1570 = vmatpush1.bf16.msra.mxu1 %v1538_v28  ;;  %v874_v8 = vld [vmem:[#allocation2 + $0x80] sm:$0xff]  ;;  %v876_v4 = vld [vmem:[#allocation2 + $0x90] sm:$0xff]  ;;  %v861_v56 = vld [vmem:[#allocation2 + $0x18] sm:$0xff]  ;;  %v926_v28 = vsub.s32 0, %v925_v25 }
 0x1c9   : > { %1541 = vmatprep.subr.bf16.mxu0 %v1540_v26  ;;  %1563 = vmatprep.subr.bf16.mxu1 %v1540_v26  ;;  %v877_v10 = vld [vmem:[#allocation2 + $0x98] sm:$0xff]  ;;  %v862_v49 = vld [vmem:[#allocation2 + $0x20] sm:$0xff]  ;;  %v863_v37 = vld [vmem:[#allocation2 + $0x28] sm:$0xff] }
 0x1ca   : > { %v878_v53 = vld [vmem:[#allocation2 + $0xa0] sm:$0xff]  ;;  %v879_v20 = vld [vmem:[#allocation2 + $0xa8] sm:$0xff]  ;;  %v864_v40 = vld [vmem:[#allocation2 + $0x30] sm:$0xff] }
 0x1cb   : > { %v880_v58 = vld [vmem:[#allocation2 + $0xb0] sm:$0xff]  ;;  %v865_v63 = vld [vmem:[#allocation2 + $0x38] sm:$0xff]  ;;  %v866_v60 = vld [vmem:[#allocation2 + $0x40] sm:$0xff] }
 0x1cc   : > { %1543 = vmatpush1.bf16.msra.mxu0 %v1542_v30  ;;  %1571 = vmatpush1.bf16.msra.mxu1 %v1542_v30  ;;  %v881_v51 = vld [vmem:[#allocation2 + $0xb8] sm:$0xff]  ;;  %v882_v14 = vld [vmem:[#allocation2 + $0xc0] sm:$0xff]  ;;  %v867_v15 = vld [vmem:[#allocation2 + $0x48] sm:$0xff] }
 0x1cd   : > { %1545 = vmatprep.subr.bf16.mxu0 %v1544_v35  ;;  %1564 = vmatprep.subr.bf16.mxu1 %v1544_v35  ;;  %v883_v32 = vld [vmem:[#allocation2 + $0xc8] sm:$0xff]  ;;  %v868_v16 = vld [vmem:[#allocation2 + $0x50] sm:$0xff]  ;;  %v869_v27 = vld [vmem:[#allocation2 + $0x58] sm:$0xff] }
 0x1ce   : > { %v884_v13 = vld [vmem:[#allocation2 + $0xd0] sm:$0xff]  ;;  %v885_v48 = vld [vmem:[#allocation2 + $0xd8] sm:$0xff]  ;;  %v870_v17 = vld [vmem:[#allocation2 + $0x60] sm:$0xff] }
 0x1cf   : > { %v886_v18 = vld [vmem:[#allocation2 + $0xe0] sm:$0xff]  ;;  %v871_v55 = vld [vmem:[#allocation2 + $0x68] sm:$0xff]  ;;  %v872_v41 = vld [vmem:[#allocation2 + $0x70] sm:$0xff] }
 0x1d0   : > { %1547 = vmatpush1.bf16.msra.mxu0 %v1546_v59  ;;  %1572 = vmatpush1.bf16.msra.mxu1 %v1546_v59  ;;  %v887_v22 = vld [vmem:[#allocation2 + $0xe8] sm:$0xff]  ;;  %v888_v23 = vld [vmem:[#allocation2 + $0xf0] sm:$0xff]  ;;  %v873_v24 = vld [vmem:[#allocation2 + $0x78] sm:$0xff] }
 0x1d1   : > { %1549 = vmatprep.subr.bf16.mxu0 %v1548_v38  ;;  %1565 = vmatprep.subr.bf16.mxu1 %v1548_v38  ;;  %v889_v11 = vld [vmem:[#allocation2 + $0xf8] sm:$0xff]  ;;  %v922_v26 = vld [vmem:[%s355_s6] sm:$0x3] }
 0x1d2   : > { %v2453_v50 = vrot.slane %v922_v26, %v926_v28 }
 0x1d4   : > { %1551 = vmatpush1.bf16.msra.mxu0 %v1550_v1  ;;  %1573 = vmatpush1.bf16.msra.mxu1 %v1550_v1 }
 0x1d5   : > { %1553 = vmatprep.subr.bf16.mxu0 %v1552_v45  ;;  %1566 = vmatprep.subr.bf16.mxu1 %v1552_v45 }
 0x1d8   : > { %1555 = vmatpush1.bf16.msra.mxu0 %v1554_v19  ;;  %1574 = vmatpush1.bf16.msra.mxu1 %v1554_v19 }
 0x1d9   : > { %1557 = vmatprep.subr.bf16.mxu0 %v1556_v6  ;;  %1567 = vmatprep.subr.bf16.mxu1 %v1556_v6 }
 0x1dc   : > { %1559 = vmatpush1.bf16.msra.mxu0 %v1558_v47  ;;  %1575 = vmatpush1.bf16.msra.mxu1 %v1558_v47 }
 0x1df   : > { %999 = vmatmul.mubr.f32.vlgmr.msra.gmra.mrb[0].mxu0 %v858_v7  ;;  %1095 = vmatmul.mubr.f32.vlgmr.msra.gmra.mrb[0].mxu1 %v874_v8 }
 0x1e0   : > { %1004 = vmatprep.mubr.f32.mxu0 %v1785_v0  ;;  %1100 = vmatprep.mubr.f32.mxu1 %v1785_v0 }
 0x1e3   : > { %1005 = vmatmul.mubr.f32.gmra.mrb[2].mxu0 %v859_v62  ;;  %1101 = vmatmul.mubr.f32.gmra.mrb[2].mxu1 %v875_v46 }
 0x1e4   : > { %1010 = vmatprep.mubr.f32.mxu0 %v1785_v0  ;;  %1106 = vmatprep.mubr.f32.mxu1 %v1785_v0 }
 0x1e7   : > { %1011 = vmatmul.mubr.f32.gmra.mrb[4].mxu0 %v860_v9  ;;  %1107 = vmatmul.mubr.f32.gmra.mrb[4].mxu1 %v876_v4 }
 0x1e8   : > { %1016 = vmatprep.mubr.f32.mxu0 %v1785_v0  ;;  %1112 = vmatprep.mubr.f32.mxu1 %v1785_v0 }
 0x1eb   : > { %1017 = vmatmul.mubr.f32.gmra.mrb[6].mxu0 %v861_v56  ;;  %1113 = vmatmul.mubr.f32.gmra.mrb[6].mxu1 %v877_v10 }
 0x1ec   : > { %1022 = vmatprep.mubr.f32.mxu0 %v1785_v0  ;;  %1118 = vmatprep.mubr.f32.mxu1 %v1785_v0 }
 0x1ef   : > { %1023 = vmatmul.mubr.f32.gmra.mrb[8].mxu0 %v862_v49  ;;  %1119 = vmatmul.mubr.f32.gmra.mrb[8].mxu1 %v878_v53 }
 0x1f0   : > { %1028 = vmatprep.mubr.f32.mxu0 %v1785_v0  ;;  %1124 = vmatprep.mubr.f32.mxu1 %v1785_v0 }
 0x1f3   : > { %1029 = vmatmul.mubr.f32.gmra.mrb[10].mxu0 %v863_v37  ;;  %1125 = vmatmul.mubr.f32.gmra.mrb[10].mxu1 %v879_v20 }
 0x1f4   : > { %1034 = vmatprep.mubr.f32.mxu0 %v1785_v0  ;;  %1130 = vmatprep.mubr.f32.mxu1 %v1785_v0 }
 0x1f7   : > { %1035 = vmatmul.mubr.f32.gmra.mrb[12].mxu0 %v864_v40  ;;  %1131 = vmatmul.mubr.f32.gmra.mrb[12].mxu1 %v880_v58 }
 0x1f8   : > { %1040 = vmatprep.mubr.f32.mxu0 %v1785_v0  ;;  %1136 = vmatprep.mubr.f32.mxu1 %v1785_v0 }
 0x1fb   : > { %1041 = vmatmul.mubr.f32.gmra.mrb[14].mxu0 %v865_v63  ;;  %1137 = vmatmul.mubr.f32.gmra.mrb[14].mxu1 %v881_v51 }
 0x1fc   : > { %1046 = vmatprep.mubr.f32.mxu0 %v1785_v0  ;;  %1142 = vmatprep.mubr.f32.mxu1 %v1785_v0 }
 0x1ff   : > { %1047 = vmatmul.mubr.f32.gmra.mrb[16].mxu0 %v866_v60  ;;  %1143 = vmatmul.mubr.f32.gmra.mrb[16].mxu1 %v882_v14 }
 0x200   : > { %1052 = vmatprep.mubr.f32.mxu0 %v1785_v0  ;;  %1148 = vmatprep.mubr.f32.mxu1 %v1785_v0 }
 0x203   : > { %1053 = vmatmul.mubr.f32.gmra.mrb[18].mxu0 %v867_v15  ;;  %1149 = vmatmul.mubr.f32.gmra.mrb[18].mxu1 %v883_v32 }
 0x204   : > { %1058 = vmatprep.mubr.f32.mxu0 %v1785_v0  ;;  %1154 = vmatprep.mubr.f32.mxu1 %v1785_v0 }
 0x207   : > { %1059 = vmatmul.mubr.f32.gmra.mrb[20].mxu0 %v868_v16  ;;  %1155 = vmatmul.mubr.f32.gmra.mrb[20].mxu1 %v884_v13 }
 0x208   : > { %1064 = vmatprep.mubr.f32.mxu0 %v1785_v0  ;;  %1160 = vmatprep.mubr.f32.mxu1 %v1785_v0 }
 0x20b   : > { %1065 = vmatmul.mubr.f32.gmra.mrb[22].mxu0 %v869_v27  ;;  %1161 = vmatmul.mubr.f32.gmra.mrb[22].mxu1 %v885_v48 }
 0x20c   : > { %1070 = vmatprep.mubr.f32.mxu0 %v1785_v0  ;;  %1166 = vmatprep.mubr.f32.mxu1 %v1785_v0 }
 0x20f   : > { %1071 = vmatmul.mubr.f32.gmra.mrb[24].mxu0 %v870_v17  ;;  %1167 = vmatmul.mubr.f32.gmra.mrb[24].mxu1 %v886_v18 }
 0x210   : > { %1076 = vmatprep.mubr.f32.mxu0 %v1785_v0  ;;  %1172 = vmatprep.mubr.f32.mxu1 %v1785_v0 }
 0x213   : > { %1077 = vmatmul.mubr.f32.gmra.mrb[26].mxu0 %v871_v55  ;;  %1173 = vmatmul.mubr.f32.gmra.mrb[26].mxu1 %v887_v22 }
 0x214   : > { %1082 = vmatprep.mubr.f32.mxu0 %v1785_v0  ;;  %1178 = vmatprep.mubr.f32.mxu1 %v1785_v0 }
 0x217   : > { %1083 = vmatmul.mubr.f32.gmra.mrb[28].mxu0 %v872_v41  ;;  %1179 = vmatmul.mubr.f32.gmra.mrb[28].mxu1 %v888_v23 }
 0x218   : > { %1088 = vmatprep.mubr.f32.mxu0 %v1785_v0  ;;  %1184 = vmatprep.mubr.f32.mxu1 %v1785_v0  ;;  %v2455_v0 = vrot.slane %v922_v26, %v930_v5 }
 0x21b   : > { %1089 = vmatmul.mubr.f32.gmra.mrb[30].mxu0 %v873_v24  ;;  %1185 = vmatmul.mubr.f32.gmra.mrb[30].mxu1 %v889_v11 }
 0x2b2   : > { %v1000_v21 = vpop.f32.mrb[0].mxu0  ;;  %v1096_v57 = vpop.f32.mrb[0].mxu1 }
 0x2b3   : > { %v1001_v30 = vadd.f32 %v1000_v21, %v2453_v50  ;;  %v1097_v35 = vadd.f32 %v1096_v57, %v2453_v50  ;;  %v1002_v43 = vpop.f32.mrb[1].mxu0  ;;  %v1098_v31 = vpop.f32.mrb[1].mxu1 }
 0x2b4   : > { %v1003_v33 = vadd.f32 %v1002_v43, %v2455_v0  ;;  %v1099_v34 = vadd.f32 %v1098_v31, %v2455_v0 }
 0x2b5   : > { %1191 = vst [vmem:[%s1987_s3] sm:$0xff] %v1001_v30  ;;  %1223 = vst [vmem:[%s1987_s3 + $0x100] sm:$0xff] %v1097_v35 }
 0x2b6   : > { %1192 = vst [vmem:[%s1987_s3 + $0x8] sm:$0xff] %v1003_v33  ;;  %1224 = vst [vmem:[%s1987_s3 + $0x108] sm:$0xff] %v1099_v34  ;;  %v1006_v59 = vpop.f32.mrb[2].mxu0  ;;  %v1102_v38 = vpop.f32.mrb[2].mxu1 }
 0x2b7   : > { %v1007_v44 = vadd.f32 %v1006_v59, %v2453_v50  ;;  %v1103_v39 = vadd.f32 %v1102_v38, %v2453_v50  ;;  %v1008_v52 = vpop.f32.mrb[3].mxu0  ;;  %v1104_v12 = vpop.f32.mrb[3].mxu1 }
 0x2b8   : > { %v1009_v1 = vadd.f32 %v1008_v52, %v2455_v0  ;;  %v1105_v45 = vadd.f32 %v1104_v12, %v2455_v0 }
 0x2b9   : > { %1193 = vst [vmem:[%s1987_s3 + $0x10] sm:$0xff] %v1007_v44  ;;  %1225 = vst [vmem:[%s1987_s3 + $0x110] sm:$0xff] %v1103_v39 }
 0x2ba   : > { %1194 = vst [vmem:[%s1987_s3 + $0x18] sm:$0xff] %v1009_v1  ;;  %1226 = vst [vmem:[%s1987_s3 + $0x118] sm:$0xff] %v1105_v45  ;;  %v1012_v36 = vpop.f32.mrb[4].mxu0  ;;  %v1108_v29 = vpop.f32.mrb[4].mxu1 }
 0x2bb   : > { %v1013_v2 = vadd.f32 %v1012_v36, %v2453_v50  ;;  %v1109_v61 = vadd.f32 %v1108_v29, %v2453_v50  ;;  %v1014_v19 = vpop.f32.mrb[5].mxu0  ;;  %v1110_v6 = vpop.f32.mrb[5].mxu1 }
 0x2bc   : > { %v1015_v3 = vadd.f32 %v1014_v19, %v2455_v0  ;;  %v1111_v54 = vadd.f32 %v1110_v6, %v2455_v0 }
 0x2bd   : > { %1195 = vst [vmem:[%s1987_s3 + $0x20] sm:$0xff] %v1013_v2  ;;  %1227 = vst [vmem:[%s1987_s3 + $0x120] sm:$0xff] %v1109_v61 }
 0x2be   : > { %1196 = vst [vmem:[%s1987_s3 + $0x28] sm:$0xff] %v1015_v3  ;;  %1228 = vst [vmem:[%s1987_s3 + $0x128] sm:$0xff] %v1111_v54  ;;  %v1018_v47 = vpop.f32.mrb[6].mxu0  ;;  %v1114_v7 = vpop.f32.mrb[6].mxu1 }
 0x2bf   : > { %v1019_v8 = vadd.f32 %v1018_v47, %v2453_v50  ;;  %v1115_v62 = vadd.f32 %v1114_v7, %v2453_v50  ;;  %v1020_v46 = vpop.f32.mrb[7].mxu0  ;;  %v1116_v9 = vpop.f32.mrb[7].mxu1 }
 0x2c0   : > { %v1021_v4 = vadd.f32 %v1020_v46, %v2455_v0  ;;  %v1117_v56 = vadd.f32 %v1116_v9, %v2455_v0 }
 0x2c1   : > { %1197 = vst [vmem:[%s1987_s3 + $0x30] sm:$0xff] %v1019_v8  ;;  %1229 = vst [vmem:[%s1987_s3 + $0x130] sm:$0xff] %v1115_v62 }
 0x2c2   : > { %1198 = vst [vmem:[%s1987_s3 + $0x38] sm:$0xff] %v1021_v4  ;;  %1230 = vst [vmem:[%s1987_s3 + $0x138] sm:$0xff] %v1117_v56  ;;  %v1024_v10 = vpop.f32.mrb[8].mxu0  ;;  %v1120_v49 = vpop.f32.mrb[8].mxu1 }
 0x2c3   : > { %v1025_v53 = vadd.f32 %v1024_v10, %v2453_v50  ;;  %v1121_v37 = vadd.f32 %v1120_v49, %v2453_v50  ;;  %v1026_v20 = vpop.f32.mrb[9].mxu0  ;;  %v1122_v40 = vpop.f32.mrb[9].mxu1 }
 0x2c4   : > { %v1027_v58 = vadd.f32 %v1026_v20, %v2455_v0  ;;  %v1123_v63 = vadd.f32 %v1122_v40, %v2455_v0 }
 0x2c5   : > { %1199 = vst [vmem:[%s1987_s3 + $0x40] sm:$0xff] %v1025_v53  ;;  %1231 = vst [vmem:[%s1987_s3 + $0x140] sm:$0xff] %v1121_v37 }
 0x2c6   : > { %1200 = vst [vmem:[%s1987_s3 + $0x48] sm:$0xff] %v1027_v58  ;;  %1232 = vst [vmem:[%s1987_s3 + $0x148] sm:$0xff] %v1123_v63  ;;  %v1030_v51 = vpop.f32.mrb[10].mxu0  ;;  %v1126_v60 = vpop.f32.mrb[10].mxu1 }
 0x2c7   : > { %v1031_v14 = vadd.f32 %v1030_v51, %v2453_v50  ;;  %v1127_v15 = vadd.f32 %v1126_v60, %v2453_v50  ;;  %v1032_v32 = vpop.f32.mrb[11].mxu0  ;;  %v1128_v16 = vpop.f32.mrb[11].mxu1 }
 0x2c8   : > { %v1033_v13 = vadd.f32 %v1032_v32, %v2455_v0  ;;  %v1129_v27 = vadd.f32 %v1128_v16, %v2455_v0 }
 0x2c9   : > { %1201 = vst [vmem:[%s1987_s3 + $0x50] sm:$0xff] %v1031_v14  ;;  %1233 = vst [vmem:[%s1987_s3 + $0x150] sm:$0xff] %v1127_v15 }
 0x2ca   : > { %1202 = vst [vmem:[%s1987_s3 + $0x58] sm:$0xff] %v1033_v13  ;;  %1234 = vst [vmem:[%s1987_s3 + $0x158] sm:$0xff] %v1129_v27  ;;  %v1036_v48 = vpop.f32.mrb[12].mxu0  ;;  %v1132_v17 = vpop.f32.mrb[12].mxu1 }
 0x2cb   : > { %v1037_v18 = vadd.f32 %v1036_v48, %v2453_v50  ;;  %v1133_v55 = vadd.f32 %v1132_v17, %v2453_v50  ;;  %v1038_v22 = vpop.f32.mrb[13].mxu0  ;;  %v1134_v41 = vpop.f32.mrb[13].mxu1 }
 0x2cc   : > { %v1039_v23 = vadd.f32 %v1038_v22, %v2455_v0  ;;  %v1135_v24 = vadd.f32 %v1134_v41, %v2455_v0 }
 0x2cd   : > { %1203 = vst [vmem:[%s1987_s3 + $0x60] sm:$0xff] %v1037_v18  ;;  %1235 = vst [vmem:[%s1987_s3 + $0x160] sm:$0xff] %v1133_v55 }
 0x2ce   : > { %1204 = vst [vmem:[%s1987_s3 + $0x68] sm:$0xff] %v1039_v23  ;;  %1236 = vst [vmem:[%s1987_s3 + $0x168] sm:$0xff] %v1135_v24  ;;  %v1042_v11 = vpop.f32.mrb[14].mxu0  ;;  %v1138_v42 = vpop.f32.mrb[14].mxu1 }
 0x2cf   : > { %v1043_v25 = vadd.f32 %v1042_v11, %v2453_v50  ;;  %v1139_v28 = vadd.f32 %v1138_v42, %v2453_v50  ;;  %v1044_v26 = vpop.f32.mrb[15].mxu0  ;;  %v1140_v5 = vpop.f32.mrb[15].mxu1 }
 0x2d0   : > { %v1045_v21 = vadd.f32 %v1044_v26, %v2455_v0  ;;  %v1141_v57 = vadd.f32 %v1140_v5, %v2455_v0 }
 0x2d1   : > { %1205 = vst [vmem:[%s1987_s3 + $0x70] sm:$0xff] %v1043_v25  ;;  %1237 = vst [vmem:[%s1987_s3 + $0x170] sm:$0xff] %v1139_v28 }
 0x2d2   : > { %1206 = vst [vmem:[%s1987_s3 + $0x78] sm:$0xff] %v1045_v21  ;;  %1238 = vst [vmem:[%s1987_s3 + $0x178] sm:$0xff] %v1141_v57  ;;  %v1048_v30 = vpop.f32.mrb[16].mxu0  ;;  %v1144_v35 = vpop.f32.mrb[16].mxu1 }
 0x2d3   : > { %v1049_v43 = vadd.f32 %v1048_v30, %v2453_v50  ;;  %v1145_v31 = vadd.f32 %v1144_v35, %v2453_v50  ;;  %v1050_v33 = vpop.f32.mrb[17].mxu0  ;;  %v1146_v34 = vpop.f32.mrb[17].mxu1 }
 0x2d4   : > { %v1051_v59 = vadd.f32 %v1050_v33, %v2455_v0  ;;  %v1147_v38 = vadd.f32 %v1146_v34, %v2455_v0  ;;  %v1288_v33 = vld [vmem:[%s1987_s3 + $0x20] sm:$0xff] (%p1883_p9)  ;;  %v1290_v34 = vld [vmem:[%s1987_s3 + $0x28] sm:$0xff] (%p1883_p9) }
 0x2d5   : > { %1207 = vst [vmem:[%s1987_s3 + $0x80] sm:$0xff] %v1049_v43  ;;  %1239 = vst [vmem:[%s1987_s3 + $0x180] sm:$0xff] %v1145_v31  ;;  %v1284_v43 = vld [vmem:[%s1987_s3 + $0x10] sm:$0xff] (%p1883_p9)  ;;  %v1286_v31 = vld [vmem:[%s1987_s3 + $0x18] sm:$0xff] (%p1883_p9) }
 0x2d6   : > { %1208 = vst [vmem:[%s1987_s3 + $0x88] sm:$0xff] %v1051_v59  ;;  %1240 = vst [vmem:[%s1987_s3 + $0x188] sm:$0xff] %v1147_v38  ;;  %v1054_v44 = vpop.f32.mrb[18].mxu0  ;;  %v1150_v39 = vpop.f32.mrb[18].mxu1  ;;  %v1292_v59 = vld [vmem:[%s1987_s3 + $0x30] sm:$0xff] (%p1883_p9)  ;;  %v1294_v38 = vld [vmem:[%s1987_s3 + $0x38] sm:$0xff] (%p1883_p9) }
 0x2d7   : > { %v1055_v52 = vadd.f32 %v1054_v44, %v2453_v50  ;;  %v1151_v12 = vadd.f32 %v1150_v39, %v2453_v50  ;;  %v1056_v1 = vpop.f32.mrb[19].mxu0  ;;  %v1152_v45 = vpop.f32.mrb[19].mxu1  ;;  %v1296_v44 = vld [vmem:[%s1987_s3 + $0x40] sm:$0xff] (%p1883_p9)  ;;  %v1298_v39 = vld [vmem:[%s1987_s3 + $0x48] sm:$0xff] (%p1883_p9)  ;;  %1285 = vst [vmem:[%s2601_s20 + $0x20] sm:$0xff] (%p1883_p9), %v1284_v43  ;;  %1287 = vst [vmem:[%s2601_s20 + $0x28] sm:$0xff] (%p1883_p9), %v1286_v31 }
 0x2d8   : > { %v1057_v36 = vadd.f32 %v1056_v1, %v2455_v0  ;;  %v1153_v29 = vadd.f32 %v1152_v45, %v2455_v0  ;;  %1289 = vst [vmem:[%s2601_s20 + $0x40] sm:$0xff] (%p1883_p9), %v1288_v33  ;;  %1291 = vst [vmem:[%s2601_s20 + $0x48] sm:$0xff] (%p1883_p9), %v1290_v34  ;;  %v1304_v1 = vld [vmem:[%s1987_s3 + $0x60] sm:$0xff] (%p1883_p9)  ;;  %v1306_v45 = vld [vmem:[%s1987_s3 + $0x68] sm:$0xff] (%p1883_p9) }
 0x2d9   : > { %1209 = vst [vmem:[%s1987_s3 + $0x90] sm:$0xff] %v1055_v52  ;;  %1241 = vst [vmem:[%s1987_s3 + $0x190] sm:$0xff] %v1151_v12  ;;  %v1300_v52 = vld [vmem:[%s1987_s3 + $0x50] sm:$0xff] (%p1883_p9)  ;;  %v1302_v12 = vld [vmem:[%s1987_s3 + $0x58] sm:$0xff] (%p1883_p9) }
 0x2da   : > { %1210 = vst [vmem:[%s1987_s3 + $0x98] sm:$0xff] %v1057_v36  ;;  %1242 = vst [vmem:[%s1987_s3 + $0x198] sm:$0xff] %v1153_v29  ;;  %v1060_v2 = vpop.f32.mrb[20].mxu0  ;;  %v1156_v61 = vpop.f32.mrb[20].mxu1  ;;  %v1308_v36 = vld [vmem:[%s1987_s3 + $0x70] sm:$0xff] (%p1883_p9)  ;;  %v1310_v29 = vld [vmem:[%s1987_s3 + $0x78] sm:$0xff] (%p1883_p9) }
 0x2db   : > { %v1061_v19 = vadd.f32 %v1060_v2, %v2453_v50  ;;  %v1157_v6 = vadd.f32 %v1156_v61, %v2453_v50  ;;  %v1062_v3 = vpop.f32.mrb[21].mxu0  ;;  %v1158_v54 = vpop.f32.mrb[21].mxu1  ;;  %1293 = vst [vmem:[%s2601_s20 + $0x60] sm:$0xff] (%p1883_p9), %v1292_v59  ;;  %1295 = vst [vmem:[%s2601_s20 + $0x68] sm:$0xff] (%p1883_p9), %v1294_v38 }
 0x2dc   : > { %v1063_v47 = vadd.f32 %v1062_v3, %v2455_v0  ;;  %v1159_v7 = vadd.f32 %v1158_v54, %v2455_v0  ;;  %1297 = vst [vmem:[%s2601_s20 + $0x80] sm:$0xff] (%p1883_p9), %v1296_v44  ;;  %1299 = vst [vmem:[%s2601_s20 + $0x88] sm:$0xff] (%p1883_p9), %v1298_v39  ;;  %v1312_v2 = vld [vmem:[%s1987_s3 + $0x80] sm:$0xff] (%p1883_p9) }
 0x2dd   : > { %1211 = vst [vmem:[%s1987_s3 + $0xa0] sm:$0xff] %v1061_v19  ;;  %1243 = vst [vmem:[%s1987_s3 + $0x1a0] sm:$0xff] %v1157_v6  ;;  %v1314_v61 = vld [vmem:[%s1987_s3 + $0x88] sm:$0xff] (%p1883_p9) }
 0x2de   : > { %1212 = vst [vmem:[%s1987_s3 + $0xa8] sm:$0xff] %v1063_v47  ;;  %1244 = vst [vmem:[%s1987_s3 + $0x1a8] sm:$0xff] %v1159_v7  ;;  %v1066_v8 = vpop.f32.mrb[22].mxu0  ;;  %v1162_v62 = vpop.f32.mrb[22].mxu1 }
 0x2df   : > { %v1067_v46 = vadd.f32 %v1066_v8, %v2453_v50  ;;  %v1163_v9 = vadd.f32 %v1162_v62, %v2453_v50  ;;  %v1068_v4 = vpop.f32.mrb[23].mxu0  ;;  %v1164_v56 = vpop.f32.mrb[23].mxu1  ;;  %1301 = vst [vmem:[%s2601_s20 + $0xa0] sm:$0xff] (%p1883_p9), %v1300_v52  ;;  %1303 = vst [vmem:[%s2601_s20 + $0xa8] sm:$0xff] (%p1883_p9), %v1302_v12 }
 0x2e0   : > { %v1069_v10 = vadd.f32 %v1068_v4, %v2455_v0  ;;  %v1165_v49 = vadd.f32 %v1164_v56, %v2455_v0  ;;  %1305 = vst [vmem:[%s2601_s20 + $0xc0] sm:$0xff] (%p1883_p9), %v1304_v1  ;;  %1307 = vst [vmem:[%s2601_s20 + $0xc8] sm:$0xff] (%p1883_p9), %v1306_v45  ;;  %v1316_v19 = vld [vmem:[%s1987_s3 + $0x90] sm:$0xff] (%p1883_p9) }
 0x2e1   : > { %1213 = vst [vmem:[%s1987_s3 + $0xb0] sm:$0xff] %v1067_v46  ;;  %1245 = vst [vmem:[%s1987_s3 + $0x1b0] sm:$0xff] %v1163_v9  ;;  %v1318_v6 = vld [vmem:[%s1987_s3 + $0x98] sm:$0xff] (%p1883_p9) }
 0x2e2   : > { %1214 = vst [vmem:[%s1987_s3 + $0xb8] sm:$0xff] %v1069_v10  ;;  %1246 = vst [vmem:[%s1987_s3 + $0x1b8] sm:$0xff] %v1165_v49  ;;  %v1072_v53 = vpop.f32.mrb[24].mxu0  ;;  %v1168_v37 = vpop.f32.mrb[24].mxu1 }
 0x2e3   : > { %v1073_v20 = vadd.f32 %v1072_v53, %v2453_v50  ;;  %v1169_v40 = vadd.f32 %v1168_v37, %v2453_v50  ;;  %v1074_v58 = vpop.f32.mrb[25].mxu0  ;;  %v1170_v63 = vpop.f32.mrb[25].mxu1  ;;  %1309 = vst [vmem:[%s2601_s20 + $0xe0] sm:$0xff] (%p1883_p9), %v1308_v36  ;;  %1311 = vst [vmem:[%s2601_s20 + $0xe8] sm:$0xff] (%p1883_p9), %v1310_v29  ;;  %v1344_v53 = vld [vmem:[%s1987_s3 + $0x100] sm:$0xff] (%p1883_p9)  ;;  %v1346_v37 = vld [vmem:[%s1987_s3 + $0x108] sm:$0xff] (%p1883_p9) }
 0x2e4   : > { %v1075_v51 = vadd.f32 %v1074_v58, %v2455_v0  ;;  %v1171_v60 = vadd.f32 %v1170_v63, %v2455_v0  ;;  %1313 = vst [vmem:[%s2601_s20 + $0x100] sm:$0xff] (%p1883_p9), %v1312_v2  ;;  %1315 = vst [vmem:[%s2601_s20 + $0x108] sm:$0xff] (%p1883_p9), %v1314_v61  ;;  %v1320_v3 = vld [vmem:[%s1987_s3 + $0xa0] sm:$0xff] (%p1883_p9)  ;;  %v1354_v63 = vld [vmem:[%s1987_s3 + $0x128] sm:$0xff] (%p1883_p9) }
 0x2e5   : > { %1215 = vst [vmem:[%s1987_s3 + $0xc0] sm:$0xff] %v1073_v20  ;;  %1247 = vst [vmem:[%s1987_s3 + $0x1c0] sm:$0xff] %v1169_v40  ;;  %v1322_v54 = vld [vmem:[%s1987_s3 + $0xa8] sm:$0xff] (%p1883_p9)  ;;  %v1348_v20 = vld [vmem:[%s1987_s3 + $0x110] sm:$0xff] (%p1883_p9) }
 0x2e6   : > { %1216 = vst [vmem:[%s1987_s3 + $0xc8] sm:$0xff] %v1075_v51  ;;  %1248 = vst [vmem:[%s1987_s3 + $0x1c8] sm:$0xff] %v1171_v60  ;;  %v1078_v14 = vpop.f32.mrb[26].mxu0  ;;  %v1174_v15 = vpop.f32.mrb[26].mxu1  ;;  %v1350_v40 = vld [vmem:[%s1987_s3 + $0x118] sm:$0xff] (%p1883_p9)  ;;  %v1352_v58 = vld [vmem:[%s1987_s3 + $0x120] sm:$0xff] (%p1883_p9) }
 0x2e7   : > { %v1079_v32 = vadd.f32 %v1078_v14, %v2453_v50  ;;  %v1175_v16 = vadd.f32 %v1174_v15, %v2453_v50  ;;  %v1080_v13 = vpop.f32.mrb[27].mxu0  ;;  %v1176_v27 = vpop.f32.mrb[27].mxu1  ;;  %1317 = vst [vmem:[%s2601_s20 + $0x120] sm:$0xff] (%p1883_p9), %v1316_v19  ;;  %1319 = vst [vmem:[%s2601_s20 + $0x128] sm:$0xff] (%p1883_p9), %v1318_v6  ;;  %v1356_v51 = vld [vmem:[%s1987_s3 + $0x130] sm:$0xff] (%p1883_p9)  ;;  %v1358_v60 = vld [vmem:[%s1987_s3 + $0x138] sm:$0xff] (%p1883_p9) }
 0x2e8   : > { %v1081_v48 = vadd.f32 %v1080_v13, %v2455_v0  ;;  %v1177_v17 = vadd.f32 %v1176_v27, %v2455_v0  ;;  %1321 = vst [vmem:[%s2601_s20 + $0x140] sm:$0xff] (%p1883_p9), %v1320_v3  ;;  %v1324_v47 = vld [vmem:[%s1987_s3 + $0xb0] sm:$0xff] (%p1883_p9)  ;;  %1323 = vst [vmem:[%s2601_s20 + $0x148] sm:$0xff] (%p1883_p9), %v1322_v54  ;;  %v1360_v14 = vld [vmem:[%s1987_s3 + $0x140] sm:$0xff] (%p1883_p9) }
 0x2e9   : > { %1217 = vst [vmem:[%s1987_s3 + $0xd0] sm:$0xff] %v1079_v32  ;;  %1249 = vst [vmem:[%s1987_s3 + $0x1d0] sm:$0xff] %v1175_v16  ;;  %v1326_v7 = vld [vmem:[%s1987_s3 + $0xb8] sm:$0xff] (%p1883_p9)  ;;  %v1362_v15 = vld [vmem:[%s1987_s3 + $0x148] sm:$0xff] (%p1883_p9) }
 0x2ea   : > { %1218 = vst [vmem:[%s1987_s3 + $0xd8] sm:$0xff] %v1081_v48  ;;  %1250 = vst [vmem:[%s1987_s3 + $0x1d8] sm:$0xff] %v1177_v17  ;;  %v1084_v18 = vpop.f32.mrb[28].mxu0  ;;  %v1180_v55 = vpop.f32.mrb[28].mxu1  ;;  %v1364_v32 = vld [vmem:[%s1987_s3 + $0x150] sm:$0xff] (%p1883_p9)  ;;  %v1366_v16 = vld [vmem:[%s1987_s3 + $0x158] sm:$0xff] (%p1883_p9) }
 0x2eb   : > { %v1085_v22 = vadd.f32 %v1084_v18, %v2453_v50  ;;  %v1181_v41 = vadd.f32 %v1180_v55, %v2453_v50  ;;  %v1086_v23 = vpop.f32.mrb[29].mxu0  ;;  %v1182_v24 = vpop.f32.mrb[29].mxu1  ;;  %1325 = vst [vmem:[%s2601_s20 + $0x160] sm:$0xff] (%p1883_p9), %v1324_v47  ;;  %1327 = vst [vmem:[%s2601_s20 + $0x168] sm:$0xff] (%p1883_p9), %v1326_v7  ;;  %v1368_v13 = vld [vmem:[%s1987_s3 + $0x160] sm:$0xff] (%p1883_p9)  ;;  %v1370_v27 = vld [vmem:[%s1987_s3 + $0x168] sm:$0xff] (%p1883_p9) }
 0x2ec   : > { %v1087_v11 = vadd.f32 %v1086_v23, %v2455_v0  ;;  %v1183_v42 = vadd.f32 %v1182_v24, %v2455_v0  ;;  %1261 = sbr.rel (!%p1883_p9) target bundleno = 773 (0x305), region = 71  ;;  %v1328_v8 = vld [vmem:[%s1987_s3 + $0xc0] sm:$0xff] (%p1883_p9)  ;;  %1345 = vst [vmem:[%s2601_s20 + $0x200] sm:$0xff] (%p1883_p9), %v1344_v53  ;;  %1347 = vst [vmem:[%s2601_s20 + $0x208] sm:$0xff] (%p1883_p9), %v1346_v37  ;;  %v1372_v48 = vld [vmem:[%s1987_s3 + $0x170] sm:$0xff] (%p1883_p9) }
 0x2ed   : > { %1219 = vst [vmem:[%s1987_s3 + $0xe0] sm:$0xff] %v1085_v22  ;;  %1251 = vst [vmem:[%s1987_s3 + $0x1e0] sm:$0xff] %v1181_v41  ;;  %v1330_v62 = vld [vmem:[%s1987_s3 + $0xc8] sm:$0xff] (%p1883_p9)  ;;  %v1374_v17 = vld [vmem:[%s1987_s3 + $0x178] sm:$0xff] (%p1883_p9) }
 0x2ee   : > { %1220 = vst [vmem:[%s1987_s3 + $0xe8] sm:$0xff] %v1087_v11  ;;  %1252 = vst [vmem:[%s1987_s3 + $0x1e8] sm:$0xff] %v1183_v42  ;;  %v1090_v25 = vpop.f32.mrb[30].mxu0  ;;  %v1186_v28 = vpop.f32.mrb[30].mxu1  ;;  %v1376_v18 = vld [vmem:[%s1987_s3 + $0x180] sm:$0xff] (%p1883_p9)  ;;  %v1378_v55 = vld [vmem:[%s1987_s3 + $0x188] sm:$0xff] (%p1883_p9) }
 0x2ef   : > { %v1091_v26 = vadd.f32 %v1090_v25, %v2453_v50  ;;  %v1187_v5 = vadd.f32 %v1186_v28, %v2453_v50  ;;  %v1092_v21 = vpop.f32.mrb[31].mxu0  ;;  %v1188_v57 = vpop.f32.mrb[31].mxu1  ;;  %v1280_v50 = vld [vmem:[%s1987_s3] sm:$0xff] (%p1883_p9)  ;;  %1329 = vst [vmem:[%s2601_s20 + $0x180] sm:$0xff] (%p1883_p9), %v1328_v8  ;;  %1331 = vst [vmem:[%s2601_s20 + $0x188] sm:$0xff] (%p1883_p9), %v1330_v62  ;;  %v1380_v22 = vld [vmem:[%s1987_s3 + $0x190] sm:$0xff] (%p1883_p9) }
 0x2f0   : > { %v1093_v30 = vadd.f32 %v1092_v21, %v2455_v0  ;;  %v1189_v35 = vadd.f32 %v1188_v57, %v2455_v0  ;;  %v1282_v0 = vld [vmem:[%s1987_s3 + $0x8] sm:$0xff] (%p1883_p9)  ;;  %1281 = vst [vmem:[%s2601_s20] sm:$0xff] (%p1883_p9), %v1280_v50  ;;  %v1332_v46 = vld [vmem:[%s1987_s3 + $0xd0] sm:$0xff] (%p1883_p9)  ;;  %1349 = vst [vmem:[%s2601_s20 + $0x220] sm:$0xff] (%p1883_p9), %v1348_v20 }
 0x2f1   : > { %1221 = vst [vmem:[%s1987_s3 + $0xf0] sm:$0xff] %v1091_v26  ;;  %1253 = vst [vmem:[%s1987_s3 + $0x1f0] sm:$0xff] %v1187_v5  ;;  %v1334_v9 = vld [vmem:[%s1987_s3 + $0xd8] sm:$0xff] (%p1883_p9)  ;;  %v1384_v23 = vld [vmem:[%s1987_s3 + $0x1a0] sm:$0xff] (%p1883_p9) }
 0x2f2   : > { %1222 = vst [vmem:[%s1987_s3 + $0xf8] sm:$0xff] %v1093_v30  ;;  %1254 = vst [vmem:[%s1987_s3 + $0x1f8] sm:$0xff] %v1189_v35  ;;  %v1382_v41 = vld [vmem:[%s1987_s3 + $0x198] sm:$0xff] (%p1883_p9)  ;;  %v1386_v24 = vld [vmem:[%s1987_s3 + $0x1a8] sm:$0xff] (%p1883_p9) }
 0x2f3   : > { %1283 = vst [vmem:[%s2601_s20 + $0x8] sm:$0xff] %v1282_v0  ;;  %1333 = vst [vmem:[%s2601_s20 + $0x1a0] sm:$0xff] %v1332_v46  ;;  %v1388_v11 = vld [vmem:[%s1987_s3 + $0x1b0] sm:$0xff]  ;;  %v1390_v42 = vld [vmem:[%s1987_s3 + $0x1b8] sm:$0xff] }
 0x2f4   : > { %v1336_v4 = vld [vmem:[%s1987_s3 + $0xe0] sm:$0xff]  ;;  %1335 = vst [vmem:[%s2601_s20 + $0x1a8] sm:$0xff] %v1334_v9  ;;  %1351 = vst [vmem:[%s2601_s20 + $0x228] sm:$0xff] %v1350_v40  ;;  %v1394_v28 = vld [vmem:[%s1987_s3 + $0x1c8] sm:$0xff] }
 0x2f5   : > { %v1338_v56 = vld [vmem:[%s1987_s3 + $0xe8] sm:$0xff]  ;;  %1337 = vst [vmem:[%s2601_s20 + $0x1c0] sm:$0xff] %v1336_v4  ;;  %1353 = vst [vmem:[%s2601_s20 + $0x240] sm:$0xff] %v1352_v58  ;;  %v1392_v25 = vld [vmem:[%s1987_s3 + $0x1c0] sm:$0xff] }
 0x2f6   : > { %1339 = vst [vmem:[%s2601_s20 + $0x1c8] sm:$0xff] %v1338_v56  ;;  %1355 = vst [vmem:[%s2601_s20 + $0x248] sm:$0xff] %v1354_v63  ;;  %v1396_v26 = vld [vmem:[%s1987_s3 + $0x1d0] sm:$0xff]  ;;  %v1398_v5 = vld [vmem:[%s1987_s3 + $0x1d8] sm:$0xff] }
 0x2f7   : > { %1357 = vst [vmem:[%s2601_s20 + $0x260] sm:$0xff] %v1356_v51  ;;  %1359 = vst [vmem:[%s2601_s20 + $0x268] sm:$0xff] %v1358_v60  ;;  %v1400_v21 = vld [vmem:[%s1987_s3 + $0x1e0] sm:$0xff]  ;;  %v1402_v57 = vld [vmem:[%s1987_s3 + $0x1e8] sm:$0xff] }
 0x2f8   : > { %v1340_v10 = vld [vmem:[%s1987_s3 + $0xf0] sm:$0xff]  ;;  %1361 = vst [vmem:[%s2601_s20 + $0x280] sm:$0xff] %v1360_v14  ;;  %1363 = vst [vmem:[%s2601_s20 + $0x288] sm:$0xff] %v1362_v15 }
 0x2f9   : > { %v1342_v49 = vld [vmem:[%s1987_s3 + $0xf8] sm:$0xff]  ;;  %1341 = vst [vmem:[%s2601_s20 + $0x1e0] sm:$0xff] %v1340_v10  ;;  %1365 = vst [vmem:[%s2601_s20 + $0x2a0] sm:$0xff] %v1364_v32  ;;  %v1404_v30 = vld [vmem:[%s1987_s3 + $0x1f0] sm:$0xff] }
 0x2fa   : > { %1343 = vst [vmem:[%s2601_s20 + $0x1e8] sm:$0xff] %v1342_v49  ;;  %1367 = vst [vmem:[%s2601_s20 + $0x2a8] sm:$0xff] %v1366_v16  ;;  %v1406_v35 = vld [vmem:[%s1987_s3 + $0x1f8] sm:$0xff] }
 0x2fb   : > { %1369 = vst [vmem:[%s2601_s20 + $0x2c0] sm:$0xff] %v1368_v13  ;;  %1371 = vst [vmem:[%s2601_s20 + $0x2c8] sm:$0xff] %v1370_v27 }
 0x2fc   : > { %1373 = vst [vmem:[%s2601_s20 + $0x2e0] sm:$0xff] %v1372_v48  ;;  %1375 = vst [vmem:[%s2601_s20 + $0x2e8] sm:$0xff] %v1374_v17 }
 0x2fd   : > { %1377 = vst [vmem:[%s2601_s20 + $0x300] sm:$0xff] %v1376_v18  ;;  %1379 = vst [vmem:[%s2601_s20 + $0x308] sm:$0xff] %v1378_v55 }
 0x2fe   : > { %1381 = vst [vmem:[%s2601_s20 + $0x320] sm:$0xff] %v1380_v22  ;;  %1383 = vst [vmem:[%s2601_s20 + $0x328] sm:$0xff] %v1382_v41 }
 0x2ff   : > { %1385 = vst [vmem:[%s2601_s20 + $0x340] sm:$0xff] %v1384_v23  ;;  %1387 = vst [vmem:[%s2601_s20 + $0x348] sm:$0xff] %v1386_v24 }
 0x300   : > { %1389 = vst [vmem:[%s2601_s20 + $0x360] sm:$0xff] %v1388_v11  ;;  %1391 = vst [vmem:[%s2601_s20 + $0x368] sm:$0xff] %v1390_v42 }
 0x301   : > { %1393 = vst [vmem:[%s2601_s20 + $0x380] sm:$0xff] %v1392_v25  ;;  %1395 = vst [vmem:[%s2601_s20 + $0x388] sm:$0xff] %v1394_v28 }
 0x302   : > { %1397 = vst [vmem:[%s2601_s20 + $0x3a0] sm:$0xff] %v1396_v26  ;;  %1399 = vst [vmem:[%s2601_s20 + $0x3a8] sm:$0xff] %v1398_v5 }
 0x303   : > { %1401 = vst [vmem:[%s2601_s20 + $0x3c0] sm:$0xff] %v1400_v21  ;;  %1403 = vst [vmem:[%s2601_s20 + $0x3c8] sm:$0xff] %v1402_v57 }
 0x304   : > { %1405 = vst [vmem:[%s2601_s20 + $0x3e0] sm:$0xff] %v1404_v30  ;;  %1407 = vst [vmem:[%s2601_s20 + $0x3e8] sm:$0xff] %v1406_v35 }
 0x305 PF: > { %s15_s26 = sadd.s32 1, %s1783_s26   ;;  %s2758_s18 = smov %s1755_s19 }
 0x306   : > { %p12_p3 = scmp.ge.s32.totalorder %s15_s26, 6   ;;  %s2759_s19 = smov %s1888_s12 }
 0x307   : > { %s2760_s20 = smov %s1763_s21  ;;  %s2761_s21 = smov %s1877_s8 }
 0x308   : > { %s2762_s22 = smov %s1775_s24  ;;  %s2763_s23 = smov %s1779_s25 }
 0x309   : > { %s2764_s24 = smov %s2767_s28  ;;  %s2765_s25 = smov %s2771_s29 }
 0x30a   :  { %14 = sbr.rel (!%p12_p3) target bundleno = 7 (0x7), region = 131 }

</bundles_post_ra>
